<compile_context>
chip_gen: v6e
topology: v6e:2x2x1
jax: 0.10.0
libtpu: 0.0.40
codegen_flags: <defaults>
</compile_context>

<pallas_src>
import math
import functools

import jax
import jax.numpy as jnp
from jax.experimental import pallas as pl
from jax.experimental.pallas import tpu as pltpu

EPS = 1e-5


def _round_up(x, m):
    return (x + m - 1) // m * m


def _pad2(a, r, c):
    return jnp.pad(a, ((0, r - a.shape[0]), (0, c - a.shape[1])))


def _pad_vec(a, n):
    return jnp.pad(a, (0, n - a.shape[0])).reshape(1, n)


def _const_spec(a):
    nd = a.ndim
    # TODO(synk): mark these constant-index operands pipeline_mode=pl.Buffered(1)
    # once single-buffer pipelining is verified on the target jax version.
    return pl.BlockSpec(a.shape, lambda i, _nd=nd: (0,) * _nd)


def _pick_bt(batch, seq, target_rows=512, attn_budget_bytes=8 << 20):
    """Pick how many batch elements to pack per grid step.

    Constraints: bt divides B; bt*S rows per step <= target_rows (bigger M
    tiles for the MXU); keep >= 2 grid steps when B >= 2 so both v7x
    TensorCores get work; (bt, S, S) attention temporaries must fit VMEM.
    """
    best = 1
    for d in range(1, batch + 1):
        if batch % d:
            continue
        if d * seq > max(seq, target_rows):
            continue
        if batch >= 2 and batch // d < 2:
            continue
        if 3 * d * seq * seq * 4 > attn_budget_bytes:
            continue
        best = d
    return best


# --------------------------------------------------------------------------
# Kernel 1: conv-as-matmul (im2col patches @ weight + bias), tiled over the
#           M = B*OH*OW rows, with per-tile partial sums for train-mode BN.
# --------------------------------------------------------------------------
def conv_mm_stats_kernel(p_ref, w_ref, b_ref, y_ref, sum_ref, ssq_ref,
                         *, rows_total, tile_m):
    # bf16 operands, fp32 accumulation on the MXU.
    y = jnp.dot(p_ref[...], w_ref[...], preferred_element_type=jnp.float32)
    y = y + b_ref[...]
    y_ref[...] = y.astype(y_ref.dtype)

    # Mask padded rows so the BN statistics stay exact.
    row = pl.program_id(0) * tile_m + jax.lax.broadcasted_iota(
        jnp.int32, y.shape, 0)
    ym = jnp.where(row < rows_total, y, 0.0)
    sum_ref[0] = jnp.sum(ym, axis=0, keepdims=True)
    ssq_ref[0] = jnp.sum(ym * ym, axis=0, keepdims=True)


def conv_bn_stats(inp, w, b, out_dtype=jnp.float32):
    """inp: (M, K) bf16/f32, w: (K, Cp) f32, b: (1, Cp) f32.
    Returns y[:M] (out_dtype), mean (Cp,), biased var (Cp,)."""
    M, K = inp.shape
    Cp = w.shape[1]
    TM = min(512, _round_up(M, 16))          # multiple of 16 (bf16 sublane tile)
    M_pad = _round_up(M, TM)
    n_tiles = M_pad // TM

    inp_p = jnp.pad(inp, ((0, M_pad - M), (0, 0))).astype(jnp.bfloat16)
    kernel = functools.partial(conv_mm_stats_kernel, rows_total=M, tile_m=TM)

    y, s, q = pl.pallas_call(
        kernel,
        grid=(n_tiles,),
        in_specs=[pl.BlockSpec((TM, K), lambda i: (i, 0)),
                  pl.BlockSpec((K, Cp), lambda i: (0, 0)),
                  pl.BlockSpec((1, Cp), lambda i: (0, 0))],
        out_specs=[pl.BlockSpec((TM, Cp), lambda i: (i, 0)),
                   pl.BlockSpec((1, 1, Cp), lambda i: (i, 0, 0)),
                   pl.BlockSpec((1, 1, Cp), lambda i: (i, 0, 0))],
        out_shape=(jax.ShapeDtypeStruct((M_pad, Cp), out_dtype),
                   jax.ShapeDtypeStruct((n_tiles, 1, Cp), jnp.float32),
                   jax.ShapeDtypeStruct((n_tiles, 1, Cp), jnp.float32)),
        compiler_params=pltpu.CompilerParams(
            dimension_semantics=("parallel",)),
    )(inp_p, w.astype(jnp.bfloat16), b)

    total = jnp.sum(s[:, 0, :], axis=0)
    totsq = jnp.sum(q[:, 0, :], axis=0)
    mean = total / M
    var = jnp.maximum(totsq / M - mean * mean, 0.0)
    return y[:M], mean, var


# --------------------------------------------------------------------------
# Kernel 2 (fused): BN1+ReLU of the conv output, TransformerBlock
#           (p + Linear(p), folded QKV projection, MultiheadAttention,
#           folded fc2(fc1(x)) + x), SE (squeeze/excite), shortcut BN,
#           residual*exc + shortcut, final ReLU.
#           Bt batch elements processed per grid step.
# --------------------------------------------------------------------------
def transformer_se_kernel(x_ref, sc_ref, s1_ref, h1_ref, s2_ref, h2_ref,
                          wlin_ref, blin_ref,
                          wqkv_ref, bqkv_ref,
                          wo_ref, bo_ref, wf_ref,
                          wse1_ref, bse1_ref, wse2_ref, bse2_ref,
                          out_ref, *, bt, seq, num_heads, head_dim):
    f32 = jnp.float32
    bf16 = jnp.bfloat16
    cp = x_ref.shape[-1]
    m = bt * seq

    def mm(a, w_ref_):                        # bf16 x bf16 -> fp32 accumulate
        return jnp.dot(a.astype(bf16), w_ref_[...],
                       preferred_element_type=f32)

    # residual-branch BN (train-mode stats folded into scale/shift) + ReLU.
    # (bt, S, Cp) -> (bt*S, Cp) is a layout-free leading-dim merge.
    x = x_ref[...].astype(f32).reshape(m, cp)
    x0 = jnp.maximum(x * s1_ref[...] + h1_ref[...], 0.0)          # (M, Cp)

    # TransformerBlock: p + Linear(p)
    xin = x0 + mm(x0, wlin_ref) + blin_ref[...]

    # Folded QKV projection: one (M, Cp) @ (Cp, 3*Cp) matmul.
    qkv = mm(xin, wqkv_ref) + bqkv_ref[...]                        # (M, 3*Cp)
    inv_sqrt_d = 1.0 / math.sqrt(head_dim)
    Qb = (qkv[:, :cp] * inv_sqrt_d).reshape(bt, seq, cp)
    Kb = qkv[:, cp:2 * cp].reshape(bt, seq, cp)
    Vb = qkv[:, 2 * cp:].reshape(bt, seq, cp)
    kb16 = Kb.astype(bf16)

    # Per-head attention via lane masking: head h's QK^T / PV use the full
    # Cp-wide (lane-dense) contraction with non-head lanes zeroed, and the
    # head outputs land at their own lane offsets -> the sum over heads IS the
    # concat, so one full out-projection suffices.
    lane = jax.lax.broadcasted_iota(jnp.int32, (1, 1, cp), 2)

    def head_body(h, acc):
        lo = h * head_dim
        mask = jnp.where((lane >= lo) & (lane < lo + head_dim), 1.0, 0.0)
        qh = (Qb * mask).astype(bf16)                              # (bt,S,Cp)
        s = jnp.einsum('bqc,bkc->bqk', qh, kb16,
                       preferred_element_type=f32)                 # (bt,S,S)
        s = s - jnp.max(s, axis=-1, keepdims=True)
        e = jnp.exp(s)
        p = e * pl.reciprocal(jnp.sum(e, axis=-1, keepdims=True), approx=True)
        vh = (Vb * mask).astype(bf16)
        return acc + jnp.einsum('bqk,bkc->bqc', p.astype(bf16), vh,
                                preferred_element_type=f32)

    mha_cat = jax.lax.fori_loop(0, num_heads, head_body,
                                jnp.zeros((bt, seq, cp), f32), unroll=True)

    mha = mm(mha_cat.reshape(m, cp), wo_ref) + bo_ref[...]

    x1 = mha + xin
    x2 = mm(x1, wf_ref) + x1                  # folded fc2(fc1(x)) + x

    # ---- SE + shortcut + final ReLU epilogue (kept in VMEM, no HBM trip) ----
    x2b = x2.reshape(bt, seq, cp)
    squeeze = jnp.mean(x2b, axis=1)                                # (bt, Cp)
    hid = jnp.maximum(mm(squeeze, wse1_ref) + bse1_ref[...], 0.0)  # (bt, Chp)
    exc = jax.nn.sigmoid(mm(hid, wse2_ref) + bse2_ref[...])        # (bt, Cp)

    sc = sc_ref[...].astype(f32) * s2_ref[...] + h2_ref[...]       # shortcut BN
    out = jnp.maximum(x2b * exc.reshape(bt, 1, cp) + sc, 0.0)
    out_ref[...] = out.astype(out_ref.dtype)


# --------------------------------------------------------------------------
# Glue: im2col patch extraction (reshapes/slices only, runs as XLA ops),
# produced directly in bf16 so the 9x-inflated patch matrix is only ever
# materialized once, at half width.
# TODO(synk): fuse the 3x3 gather into the conv kernel (strided row DMAs) to
# avoid materializing the 9x patch matrix in HBM.
# --------------------------------------------------------------------------
def im2col_3x3(x_nchw, stride):
    B, Cin, H, W = x_nchw.shape
    xp = jnp.pad(x_nchw, ((0, 0), (0, 0), (1, 1), (1, 1)))
    OH = (H + 2 - 3) // stride + 1
    OW = (W + 2 - 3) // stride + 1
    cols = []
    for kh in range(3):
        for kw in range(3):
            sl = xp[:, :, kh:kh + (OH - 1) * stride + 1:stride,
                          kw:kw + (OW - 1) * stride + 1:stride]   # (B,Cin,OH,OW)
            cols.append(sl)
    patches = jnp.stack(cols, axis=2)                             # (B,Cin,9,OH,OW)
    patches = patches.transpose(0, 3, 4, 1, 2).reshape(B * OH * OW, Cin * 9)
    return patches, OH, OW


# --------------------------------------------------------------------------
# Forward pass of BasicResidualSEBlock_T.
# --------------------------------------------------------------------------
def forward(x, params, *, stride, num_heads=4):
    B, Cin, H, W = x.shape
    C = params["conv3_w"].shape[0]
    Ch = params["w_se1"].shape[1]
    Cp = _round_up(C, 128)
    Chp = _round_up(Ch, 128)
    assert C % num_heads == 0
    head_dim = C // num_heads

    x_bf = x.astype(jnp.bfloat16)

    # ---- residual branch: 3x3 conv as matmul + BN batch stats ----
    patches, OH, OW = im2col_3x3(x_bf, stride)
    S = OH * OW
    M = B * S

    # Attention materializes (bt,S,S) scores; keep it within a sane VMEM budget.
    assert 3 * S * S * 4 <= (16 << 20), (
        "spatial size too large for full-score attention; "
        "a flash-style query-block path is required")
    # TODO(synk): add a flash-style online-softmax path for large feature maps.

    w3 = _pad2(params["conv3_w"].reshape(C, Cin * 9).T, Cin * 9, Cp)
    b3 = _pad_vec(params["conv3_b"], Cp)
    conv_flat, mean1, var1 = conv_bn_stats(patches, w3, b3,
                                           out_dtype=jnp.bfloat16)
    conv_out = conv_flat.reshape(B, S, Cp)                        # bf16 handoff

    g1 = _pad_vec(params["bn1_gamma"], Cp)[0]
    be1 = _pad_vec(params["bn1_beta"], Cp)[0]
    scale1 = (g1 / jnp.sqrt(var1 + EPS)).reshape(1, Cp)
    shift1 = (be1 - mean1 * scale1[0]).reshape(1, Cp)

    # ---- shortcut branch ----
    if stride != 1 or Cin != C:
        xs = x_bf[:, :, ::stride, ::stride].transpose(0, 2, 3, 1).reshape(M, Cin)
        w1 = _pad2(params["conv1_w"].reshape(C, Cin).T, Cin, Cp)
        b1 = _pad_vec(params["conv1_b"], Cp)
        sc_flat, mean2, var2 = conv_bn_stats(xs, w1, b1,
                                             out_dtype=jnp.bfloat16)
        g2 = _pad_vec(params["bn2_gamma"], Cp)[0]
        be2 = _pad_vec(params["bn2_beta"], Cp)[0]
        scale2 = (g2 / jnp.sqrt(var2 + EPS)).reshape(1, Cp)
        shift2 = (be2 - mean2 * scale2[0]).reshape(1, Cp)
        sc_pre = sc_flat.reshape(B, S, Cp)
    else:
        sc_nhwc = x.transpose(0, 2, 3, 1).reshape(B, S, C)
        sc_pre = jnp.pad(sc_nhwc, ((0, 0), (0, 0), (0, Cp - C))).astype(jnp.bfloat16)
        scale2 = jnp.ones((1, Cp), jnp.float32)
        shift2 = jnp.zeros((1, Cp), jnp.float32)

    # ---- fold consecutive Linear pairs (no nonlinearity between them) ----
    # Q = (xin @ Wq) @ Wiq + biq == xin @ (Wq @ Wiq) + biq, etc.
    wq_eff = params["w_q"] @ params["w_iq"]
    wk_eff = params["w_k"] @ params["w_ik"]
    wv_eff = params["w_v"] @ params["w_iv"]
    wqkv = jnp.concatenate([_pad2(wq_eff, Cp, Cp),
                            _pad2(wk_eff, Cp, Cp),
                            _pad2(wv_eff, Cp, Cp)], axis=1)        # (Cp, 3*Cp)
    bqkv = jnp.concatenate([_pad_vec(params["b_iq"], Cp),
                            _pad_vec(params["b_ik"], Cp),
                            _pad_vec(params["b_iv"], Cp)], axis=1)  # (1, 3*Cp)
    wf_eff = params["w_f1"] @ params["w_f2"]                        # fc2(fc1(x))

    bf = lambda a: a.astype(jnp.bfloat16)
    w_args = [
        scale1, shift1, scale2, shift2,
        bf(_pad2(params["w_lin"], Cp, Cp)), _pad_vec(params["b_lin"], Cp),
        bf(wqkv), bqkv,
        bf(_pad2(params["w_o"], Cp, Cp)), _pad_vec(params["b_o"], Cp),
        bf(_pad2(wf_eff, Cp, Cp)),
        bf(_pad2(params["w_se1"], Cp, Chp)), _pad_vec(params["b_se1"], Chp),
        bf(_pad2(params["w_se2"], Chp, Cp)), _pad_vec(params["b_se2"], Cp),
    ]

    bt = _pick_bt(B, S)
    seq_spec_in = pl.BlockSpec((bt, S, Cp), lambda i: (i, 0, 0))
    seq_spec_out = pl.BlockSpec((bt, S, Cp), lambda i: (i, 0, 0))

    # VMEM budget computed from the actual footprint (v7x has 64 MiB/TC).
    weight_bytes = sum(int(a.size) * a.dtype.itemsize for a in w_args)
    io_bytes = bt * S * Cp * (2 + 2 + 4)          # x bf16 + sc bf16 + out f32
    interm_bytes = (bt * S * (3 * Cp) * 4          # QKV
                    + 10 * bt * S * Cp * 4         # x0/xin/mha/x1/x2/... temporaries
                    + 4 * bt * S * S * 4)          # per-head scores/exp/probs
    vmem_limit = 2 * weight_bytes + 2 * io_bytes + interm_bytes + (4 << 20)
    vmem_limit = int(max(8 << 20, min(vmem_limit, 64 << 20)))

    kernel = functools.partial(transformer_se_kernel, bt=bt, seq=S,
                               num_heads=num_heads, head_dim=head_dim)
    out = pl.pallas_call(
        kernel,
        grid=(B // bt,),
        in_specs=[seq_spec_in, seq_spec_in] + [_const_spec(a) for a in w_args],
        out_specs=seq_spec_out,
        out_shape=jax.ShapeDtypeStruct((B, S, Cp), jnp.float32),
        compiler_params=pltpu.CompilerParams(
            dimension_semantics=("parallel",),
            vmem_limit_bytes=vmem_limit),
    )(conv_out, sc_pre, *w_args)

    # drop channel padding, back to NCHW
    out = out[:, :, :C].reshape(B, OH, OW, C).transpose(0, 3, 1, 2)
    return out


# --------------------------------------------------------------------------
# Deterministic synthetic parameter init (shapes follow the PyTorch __init__).
# --------------------------------------------------------------------------
def init_params(key, in_channels, out_channels, r=16):
    C = out_channels
    keys = iter(jax.random.split(key, 40))

    def nrm(shape, scale=0.1):
        return (scale * jax.random.normal(next(keys), shape)).astype(jnp.float32)

    return dict(
        conv3_w=nrm((C, in_channels, 3, 3)), conv3_b=nrm((C,)),
        bn1_gamma=jnp.ones((C,), jnp.float32) + nrm((C,), 0.05), bn1_beta=nrm((C,), 0.05),
        conv1_w=nrm((C, in_channels, 1, 1)), conv1_b=nrm((C,)),
        bn2_gamma=jnp.ones((C,), jnp.float32) + nrm((C,), 0.05), bn2_beta=nrm((C,), 0.05),
        w_lin=nrm((C, C)), b_lin=nrm((C,)),
        w_q=nrm((C, C)), w_k=nrm((C, C)), w_v=nrm((C, C)),
        w_iq=nrm((C, C)), b_iq=nrm((C,)),
        w_ik=nrm((C, C)), b_ik=nrm((C,)),
        w_iv=nrm((C, C)), b_iv=nrm((C,)),
        w_o=nrm((C, C)), b_o=nrm((C,)),
        w_f1=nrm((C, C)), w_f2=nrm((C, C)),
        w_se1=nrm((C, C // r)), b_se1=nrm((C // r,)),
        w_se2=nrm((C // r, C)), b_se2=nrm((C,)),
    )


if __name__ == "__main__":
    key = jax.random.PRNGKey(0)
    kx, kp = jax.random.split(key)

    B, Cin, H, W = 2, 16, 8, 8
    Cout, stride, num_heads = 32, 2, 4        # Cout % num_heads == 0, Cout // 16 >= 1

    x = jax.random.normal(kx, (B, Cin, H, W), dtype=jnp.float32)
    params = init_params(kp, Cin, Cout, r=16)

    fwd = jax.jit(functools.partial(forward, stride=stride, num_heads=num_heads))
    out = fwd(x, params)
    jax.block_until_ready(out)

    assert out.shape == (B, Cout, H // stride, W // stride)
    assert bool(jnp.all(jnp.isfinite(out)))
    print("KERNEL_OK")
</pallas_src>

<mosaic_0001>
module attributes {stable_mosaic.version = 11 : i64} {
  func.func @conv_mm_stats_kernel(%arg0: i32, %arg1: memref<32x144xbf16, #tpu.memory_space<vmem>>, %arg2: memref<144x128xbf16, #tpu.memory_space<vmem>>, %arg3: memref<1x128xf32, #tpu.memory_space<vmem>>, %arg4: memref<32x128xbf16, #tpu.memory_space<vmem>>, %arg5: memref<1x1x128xf32, #tpu.memory_space<vmem>>, %arg6: memref<1x1x128xf32, #tpu.memory_space<vmem>>) attributes {dimension_semantics = [#tpu.dimension_semantics<parallel>], iteration_bounds = array<i64: 1>, scalar_prefetch = 0 : i64, scratch_operands = 0 : i64, tpu.core_type = #tpu.core_type<tc>, window_params = [{transform_indices = @transform_0, window_bounds = array<i64: 32, 144>}, {pipeline_mode = #tpu.pipeline_mode<synchronous>, transform_indices = @transform_1, window_bounds = array<i64: 144, 128>}, {pipeline_mode = #tpu.pipeline_mode<synchronous>, transform_indices = @transform_2, window_bounds = array<i64: 1, 128>}, {transform_indices = @transform_3, window_bounds = array<i64: 32, 128>}, {transform_indices = @transform_4, window_bounds = array<i64: 1, 1, 128>}, {transform_indices = @transform_5, window_bounds = array<i64: 1, 1, 128>}]} {
    %c0 = arith.constant 0 : index
    %c0_0 = arith.constant 0 : index
    %0 = vector.load %arg1[%c0, %c0_0] : memref<32x144xbf16, #tpu.memory_space<vmem>>, vector<32x144xbf16>
    %c0_1 = arith.constant 0 : index
    %c0_2 = arith.constant 0 : index
    %1 = vector.load %arg2[%c0_1, %c0_2] : memref<144x128xbf16, #tpu.memory_space<vmem>>, vector<144x128xbf16>
    %cst = arith.constant dense<0.000000e+00> : vector<32x128xf32>
    %2 = tpu.matmul %0, %1, %cst {dimension_numbers = #tpu.dot_dimension_numbers<[1], [0], [0], [1], [0, 0, 1, 1], [], []>} : vector<32x144xbf16>, vector<144x128xbf16>, vector<32x128xf32> -> vector<32x128xf32>
    %c0_3 = arith.constant 0 : index
    %c0_4 = arith.constant 0 : index
    %3 = vector.load %arg3[%c0_3, %c0_4] : memref<1x128xf32, #tpu.memory_space<vmem>>, vector<1x128xf32>
    %4 = vector.broadcast %3 : vector<1x128xf32> to vector<32x128xf32>
    %5 = arith.addf %2, %4 : vector<32x128xf32>
    %6 = arith.truncf %5 : vector<32x128xf32> to vector<32x128xbf16>
    %c0_5 = arith.constant 0 : index
    %c0_6 = arith.constant 0 : index
    %7 = vector.load %arg4[%c0_5, %c0_6] : memref<32x128xbf16, #tpu.memory_space<vmem>>, vector<32x128xbf16>
    tpu.vector_store %arg4[%c0_5, %c0_6], %6 {strides = array<i32>} : memref<32x128xbf16, #tpu.memory_space<vmem>>, vector<32x128xbf16>,
    %c32_i32 = arith.constant 32 : i32
    %8 = arith.muli %arg0, %c32_i32 : i32
    %9 = tpu.iota {dimensions = array<i32: 0>} : vector<32x128xi32>
    %10 = vector.broadcast %8 : i32 to vector<32x128xi32>
    %11 = arith.addi %10, %9 : vector<32x128xi32>
    %c32_i32_7 = arith.constant 32 : i32
    %12 = vector.broadcast %c32_i32_7 : i32 to vector<32x128xi32>
    %13 = arith.cmpi slt, %11, %12 : vector<32x128xi32>
    %cst_8 = arith.constant 0.000000e+00 : f32
    %14 = vector.broadcast %cst_8 : f32 to vector<32x128xf32>
    %15 = arith.select %13, %5, %14 : vector<32x128xi1>, vector<32x128xf32>
    %cst_9 = arith.constant dense<0.000000e+00> : vector<128xf32>
    %16 = vector.multi_reduction <add>, %15, %cst_9 [0] : vector<32x128xf32> to vector<128xf32>
    %17 = vector.shape_cast %16 : vector<128xf32> to vector<1x128xf32>
    %c0_10 = arith.constant 0 : index
    %c0_11 = arith.constant 0 : index
    %c0_12 = arith.constant 0 : index
    %18 = vector.load %arg5[%c0_10, %c0_11, %c0_12] : memref<1x1x128xf32, #tpu.memory_space<vmem>>, vector<1x1x128xf32>
    %19 = vector.shape_cast %18 : vector<1x1x128xf32> to vector<1x128xf32>
    %20 = vector.shape_cast %17 : vector<1x128xf32> to vector<1x1x128xf32>
    tpu.vector_store %arg5[%c0_10, %c0_11, %c0_12], %20 {strides = array<i32>} : memref<1x1x128xf32, #tpu.memory_space<vmem>>, vector<1x1x128xf32>,
    %21 = arith.mulf %15, %15 : vector<32x128xf32>
    %cst_13 = arith.constant dense<0.000000e+00> : vector<128xf32>
    %22 = vector.multi_reduction <add>, %21, %cst_13 [0] : vector<32x128xf32> to vector<128xf32>
    %23 = vector.shape_cast %22 : vector<128xf32> to vector<1x128xf32>
    %c0_14 = arith.constant 0 : index
    %c0_15 = arith.constant 0 : index
    %c0_16 = arith.constant 0 : index
    %24 = vector.load %arg6[%c0_14, %c0_15, %c0_16] : memref<1x1x128xf32, #tpu.memory_space<vmem>>, vector<1x1x128xf32>
    %25 = vector.shape_cast %24 : vector<1x1x128xf32> to vector<1x128xf32>
    %26 = vector.shape_cast %23 : vector<1x128xf32> to vector<1x1x128xf32>
    tpu.vector_store %arg6[%c0_14, %c0_15, %c0_16], %26 {strides = array<i32>} : memref<1x1x128xf32, #tpu.memory_space<vmem>>, vector<1x1x128xf32>,
    return
  }
  func.func @transform_0(%arg0: i32) -> (i32, i32) {
    %c0_i32 = arith.constant 0 : i32
    %c0_i32_0 = arith.constant 0 : i32
    return %arg0, %c0_i32 : i32, i32
  }
  func.func @transform_1(%arg0: i32) -> (i32, i32) {
    %c0_i32 = arith.constant 0 : i32
    %c0_i32_0 = arith.constant 0 : i32
    %c0_i32_1 = arith.constant 0 : i32
    return %c0_i32, %c0_i32_0 : i32, i32
  }
  func.func @transform_2(%arg0: i32) -> (i32, i32) {
    %c0_i32 = arith.constant 0 : i32
    %c0_i32_0 = arith.constant 0 : i32
    %c0_i32_1 = arith.constant 0 : i32
    return %c0_i32, %c0_i32_0 : i32, i32
  }
  func.func @transform_3(%arg0: i32) -> (i32, i32) {
    %c0_i32 = arith.constant 0 : i32
    %c0_i32_0 = arith.constant 0 : i32
    return %arg0, %c0_i32 : i32, i32
  }
  func.func @transform_4(%arg0: i32) -> (i32, i32, i32) {
    %c0_i32 = arith.constant 0 : i32
    %c0_i32_0 = arith.constant 0 : i32
    %c0_i32_1 = arith.constant 0 : i32
    return %arg0, %c0_i32, %c0_i32_0 : i32, i32, i32
  }
  func.func @transform_5(%arg0: i32) -> (i32, i32, i32) {
    %c0_i32 = arith.constant 0 : i32
    %c0_i32_0 = arith.constant 0 : i32
    %c0_i32_1 = arith.constant 0 : i32
    return %arg0, %c0_i32, %c0_i32_0 : i32, i32, i32
  }
}

module attributes {stable_mosaic.version = 11 : i64} {
  func.func @conv_mm_stats_kernel(%arg0: i32, %arg1: memref<32x16xbf16, #tpu.memory_space<vmem>>, %arg2: memref<16x128xbf16, #tpu.memory_space<vmem>>, %arg3: memref<1x128xf32, #tpu.memory_space<vmem>>, %arg4: memref<32x128xbf16, #tpu.memory_space<vmem>>, %arg5: memref<1x1x128xf32, #tpu.memory_space<vmem>>, %arg6: memref<1x1x128xf32, #tpu.memory_space<vmem>>) attributes {dimension_semantics = [#tpu.dimension_semantics<parallel>], iteration_bounds = array<i64: 1>, scalar_prefetch = 0 : i64, scratch_operands = 0 : i64, tpu.core_type = #tpu.core_type<tc>, window_params = [{transform_indices = @transform_0, window_bounds = array<i64: 32, 16>}, {pipeline_mode = #tpu.pipeline_mode<synchronous>, transform_indices = @transform_1, window_bounds = array<i64: 16, 128>}, {pipeline_mode = #tpu.pipeline_mode<synchronous>, transform_indices = @transform_2, window_bounds = array<i64: 1, 128>}, {transform_indices = @transform_3, window_bounds = array<i64: 32, 128>}, {transform_indices = @transform_4, window_bounds = array<i64: 1, 1, 128>}, {transform_indices = @transform_5, window_bounds = array<i64: 1, 1, 128>}]} {
    %c0 = arith.constant 0 : index
    %c0_0 = arith.constant 0 : index
    %0 = vector.load %arg1[%c0, %c0_0] : memref<32x16xbf16, #tpu.memory_space<vmem>>, vector<32x16xbf16>
    %c0_1 = arith.constant 0 : index
    %c0_2 = arith.constant 0 : index
    %1 = vector.load %arg2[%c0_1, %c0_2] : memref<16x128xbf16, #tpu.memory_space<vmem>>, vector<16x128xbf16>
    %cst = arith.constant dense<0.000000e+00> : vector<32x128xf32>
    %2 = tpu.matmul %0, %1, %cst {dimension_numbers = #tpu.dot_dimension_numbers<[1], [0], [0], [1], [0, 0, 1, 1], [], []>} : vector<32x16xbf16>, vector<16x128xbf16>, vector<32x128xf32> -> vector<32x128xf32>
    %c0_3 = arith.constant 0 : index
    %c0_4 = arith.constant 0 : index
    %3 = vector.load %arg3[%c0_3, %c0_4] : memref<1x128xf32, #tpu.memory_space<vmem>>, vector<1x128xf32>
    %4 = vector.broadcast %3 : vector<1x128xf32> to vector<32x128xf32>
    %5 = arith.addf %2, %4 : vector<32x128xf32>
    %6 = arith.truncf %5 : vector<32x128xf32> to vector<32x128xbf16>
    %c0_5 = arith.constant 0 : index
    %c0_6 = arith.constant 0 : index
    %7 = vector.load %arg4[%c0_5, %c0_6] : memref<32x128xbf16, #tpu.memory_space<vmem>>, vector<32x128xbf16>
    tpu.vector_store %arg4[%c0_5, %c0_6], %6 {strides = array<i32>} : memref<32x128xbf16, #tpu.memory_space<vmem>>, vector<32x128xbf16>,
    %c32_i32 = arith.constant 32 : i32
    %8 = arith.muli %arg0, %c32_i32 : i32
    %9 = tpu.iota {dimensions = array<i32: 0>} : vector<32x128xi32>
    %10 = vector.broadcast %8 : i32 to vector<32x128xi32>
    %11 = arith.addi %10, %9 : vector<32x128xi32>
    %c32_i32_7 = arith.constant 32 : i32
    %12 = vector.broadcast %c32_i32_7 : i32 to vector<32x128xi32>
    %13 = arith.cmpi slt, %11, %12 : vector<32x128xi32>
    %cst_8 = arith.constant 0.000000e+00 : f32
    %14 = vector.broadcast %cst_8 : f32 to vector<32x128xf32>
    %15 = arith.select %13, %5, %14 : vector<32x128xi1>, vector<32x128xf32>
    %cst_9 = arith.constant dense<0.000000e+00> : vector<128xf32>
    %16 = vector.multi_reduction <add>, %15, %cst_9 [0] : vector<32x128xf32> to vector<128xf32>
    %17 = vector.shape_cast %16 : vector<128xf32> to vector<1x128xf32>
    %c0_10 = arith.constant 0 : index
    %c0_11 = arith.constant 0 : index
    %c0_12 = arith.constant 0 : index
    %18 = vector.load %arg5[%c0_10, %c0_11, %c0_12] : memref<1x1x128xf32, #tpu.memory_space<vmem>>, vector<1x1x128xf32>
    %19 = vector.shape_cast %18 : vector<1x1x128xf32> to vector<1x128xf32>
    %20 = vector.shape_cast %17 : vector<1x128xf32> to vector<1x1x128xf32>
    tpu.vector_store %arg5[%c0_10, %c0_11, %c0_12], %20 {strides = array<i32>} : memref<1x1x128xf32, #tpu.memory_space<vmem>>, vector<1x1x128xf32>,
    %21 = arith.mulf %15, %15 : vector<32x128xf32>
    %cst_13 = arith.constant dense<0.000000e+00> : vector<128xf32>
    %22 = vector.multi_reduction <add>, %21, %cst_13 [0] : vector<32x128xf32> to vector<128xf32>
    %23 = vector.shape_cast %22 : vector<128xf32> to vector<1x128xf32>
    %c0_14 = arith.constant 0 : index
    %c0_15 = arith.constant 0 : index
    %c0_16 = arith.constant 0 : index
    %24 = vector.load %arg6[%c0_14, %c0_15, %c0_16] : memref<1x1x128xf32, #tpu.memory_space<vmem>>, vector<1x1x128xf32>
    %25 = vector.shape_cast %24 : vector<1x1x128xf32> to vector<1x128xf32>
    %26 = vector.shape_cast %23 : vector<1x128xf32> to vector<1x1x128xf32>
    tpu.vector_store %arg6[%c0_14, %c0_15, %c0_16], %26 {strides = array<i32>} : memref<1x1x128xf32, #tpu.memory_space<vmem>>, vector<1x1x128xf32>,
    return
  }
  func.func @transform_0(%arg0: i32) -> (i32, i32) {
    %c0_i32 = arith.constant 0 : i32
    %c0_i32_0 = arith.constant 0 : i32
    return %arg0, %c0_i32 : i32, i32
  }
  func.func @transform_1(%arg0: i32) -> (i32, i32) {
    %c0_i32 = arith.constant 0 : i32
    %c0_i32_0 = arith.constant 0 : i32
    %c0_i32_1 = arith.constant 0 : i32
    return %c0_i32, %c0_i32_0 : i32, i32
  }
  func.func @transform_2(%arg0: i32) -> (i32, i32) {
    %c0_i32 = arith.constant 0 : i32
    %c0_i32_0 = arith.constant 0 : i32
    %c0_i32_1 = arith.constant 0 : i32
    return %c0_i32, %c0_i32_0 : i32, i32
  }
  func.func @transform_3(%arg0: i32) -> (i32, i32) {
    %c0_i32 = arith.constant 0 : i32
    %c0_i32_0 = arith.constant 0 : i32
    return %arg0, %c0_i32 : i32, i32
  }
  func.func @transform_4(%arg0: i32) -> (i32, i32, i32) {
    %c0_i32 = arith.constant 0 : i32
    %c0_i32_0 = arith.constant 0 : i32
    %c0_i32_1 = arith.constant 0 : i32
    return %arg0, %c0_i32, %c0_i32_0 : i32, i32, i32
  }
  func.func @transform_5(%arg0: i32) -> (i32, i32, i32) {
    %c0_i32 = arith.constant 0 : i32
    %c0_i32_0 = arith.constant 0 : i32
    %c0_i32_1 = arith.constant 0 : i32
    return %arg0, %c0_i32, %c0_i32_0 : i32, i32, i32
  }
}

module attributes {stable_mosaic.version = 11 : i64} {
  func.func @transformer_se_kernel(%arg0: i32, %arg1: memref<1x16x128xbf16, #tpu.memory_space<vmem>>, %arg2: memref<1x16x128xbf16, #tpu.memory_space<vmem>>, %arg3: memref<1x128xf32, #tpu.memory_space<vmem>>, %arg4: memref<1x128xf32, #tpu.memory_space<vmem>>, %arg5: memref<1x128xf32, #tpu.memory_space<vmem>>, %arg6: memref<1x128xf32, #tpu.memory_space<vmem>>, %arg7: memref<128x128xbf16, #tpu.memory_space<vmem>>, %arg8: memref<1x128xf32, #tpu.memory_space<vmem>>, %arg9: memref<128x384xbf16, #tpu.memory_space<vmem>>, %arg10: memref<1x384xf32, #tpu.memory_space<vmem>>, %arg11: memref<128x128xbf16, #tpu.memory_space<vmem>>, %arg12: memref<1x128xf32, #tpu.memory_space<vmem>>, %arg13: memref<128x128xbf16, #tpu.memory_space<vmem>>, %arg14: memref<128x128xbf16, #tpu.memory_space<vmem>>, %arg15: memref<1x128xf32, #tpu.memory_space<vmem>>, %arg16: memref<128x128xbf16, #tpu.memory_space<vmem>>, %arg17: memref<1x128xf32, #tpu.memory_space<vmem>>, %arg18: memref<1x16x128xf32, #tpu.memory_space<vmem>>) attributes {dimension_semantics = [#tpu.dimension_semantics<parallel>], iteration_bounds = array<i64: 2>, scalar_prefetch = 0 : i64, scratch_operands = 0 : i64, tpu.core_type = #tpu.core_type<tc>, window_params = [{transform_indices = @transform_0, window_bounds = array<i64: 1, 16, 128>}, {transform_indices = @transform_1, window_bounds = array<i64: 1, 16, 128>}, {pipeline_mode = #tpu.pipeline_mode<synchronous>, transform_indices = @transform_2, window_bounds = array<i64: 1, 128>}, {pipeline_mode = #tpu.pipeline_mode<synchronous>, transform_indices = @transform_3, window_bounds = array<i64: 1, 128>}, {pipeline_mode = #tpu.pipeline_mode<synchronous>, transform_indices = @transform_4, window_bounds = array<i64: 1, 128>}, {pipeline_mode = #tpu.pipeline_mode<synchronous>, transform_indices = @transform_5, window_bounds = array<i64: 1, 128>}, {pipeline_mode = #tpu.pipeline_mode<synchronous>, transform_indices = @transform_6, window_bounds = array<i64: 128, 128>}, {pipeline_mode = #tpu.pipeline_mode<synchronous>, transform_indices = @transform_7, window_bounds = array<i64: 1, 128>}, {pipeline_mode = #tpu.pipeline_mode<synchronous>, transform_indices = @transform_8, window_bounds = array<i64: 128, 384>}, {pipeline_mode = #tpu.pipeline_mode<synchronous>, transform_indices = @transform_9, window_bounds = array<i64: 1, 384>}, {pipeline_mode = #tpu.pipeline_mode<synchronous>, transform_indices = @transform_10, window_bounds = array<i64: 128, 128>}, {pipeline_mode = #tpu.pipeline_mode<synchronous>, transform_indices = @transform_11, window_bounds = array<i64: 1, 128>}, {pipeline_mode = #tpu.pipeline_mode<synchronous>, transform_indices = @transform_12, window_bounds = array<i64: 128, 128>}, {pipeline_mode = #tpu.pipeline_mode<synchronous>, transform_indices = @transform_13, window_bounds = array<i64: 128, 128>}, {pipeline_mode = #tpu.pipeline_mode<synchronous>, transform_indices = @transform_14, window_bounds = array<i64: 1, 128>}, {pipeline_mode = #tpu.pipeline_mode<synchronous>, transform_indices = @transform_15, window_bounds = array<i64: 128, 128>}, {pipeline_mode = #tpu.pipeline_mode<synchronous>, transform_indices = @transform_16, window_bounds = array<i64: 1, 128>}, {transform_indices = @transform_17, window_bounds = array<i64: 1, 16, 128>}]} {
    %c0 = arith.constant 0 : index
    %c0_0 = arith.constant 0 : index
    %c0_1 = arith.constant 0 : index
    %0 = vector.load %arg1[%c0, %c0_0, %c0_1] : memref<1x16x128xbf16, #tpu.memory_space<vmem>>, vector<1x16x128xbf16>
    %1 = arith.extf %0 : vector<1x16x128xbf16> to vector<1x16x128xf32>
    %2 = vector.shape_cast %1 : vector<1x16x128xf32> to vector<16x128xf32>
    %c0_2 = arith.constant 0 : index
    %c0_3 = arith.constant 0 : index
    %3 = vector.load %arg3[%c0_2, %c0_3] : memref<1x128xf32, #tpu.memory_space<vmem>>, vector<1x128xf32>
    %4 = vector.broadcast %3 : vector<1x128xf32> to vector<16x128xf32>
    %5 = arith.mulf %2, %4 : vector<16x128xf32>
    %c0_4 = arith.constant 0 : index
    %c0_5 = arith.constant 0 : index
    %6 = vector.load %arg4[%c0_4, %c0_5] : memref<1x128xf32, #tpu.memory_space<vmem>>, vector<1x128xf32>
    %7 = vector.broadcast %6 : vector<1x128xf32> to vector<16x128xf32>
    %8 = arith.addf %5, %7 : vector<16x128xf32>
    %cst = arith.constant 0.000000e+00 : f32
    %9 = vector.broadcast %cst : f32 to vector<16x128xf32>
    %10 = arith.maximumf %8, %9 : vector<16x128xf32>
    %11 = arith.truncf %10 : vector<16x128xf32> to vector<16x128xbf16>
    %c0_6 = arith.constant 0 : index
    %c0_7 = arith.constant 0 : index
    %12 = vector.load %arg7[%c0_6, %c0_7] : memref<128x128xbf16, #tpu.memory_space<vmem>>, vector<128x128xbf16>
    %cst_8 = arith.constant dense<0.000000e+00> : vector<16x128xf32>
    %13 = tpu.matmul %11, %12, %cst_8 {dimension_numbers = #tpu.dot_dimension_numbers<[1], [0], [0], [1], [0, 0, 1, 1], [], []>} : vector<16x128xbf16>, vector<128x128xbf16>, vector<16x128xf32> -> vector<16x128xf32>
    %14 = arith.addf %10, %13 : vector<16x128xf32>
    %c0_9 = arith.constant 0 : index
    %c0_10 = arith.constant 0 : index
    %15 = vector.load %arg8[%c0_9, %c0_10] : memref<1x128xf32, #tpu.memory_space<vmem>>, vector<1x128xf32>
    %16 = vector.broadcast %15 : vector<1x128xf32> to vector<16x128xf32>
    %17 = arith.addf %14, %16 : vector<16x128xf32>
    %18 = arith.truncf %17 : vector<16x128xf32> to vector<16x128xbf16>
    %c0_11 = arith.constant 0 : index
    %c0_12 = arith.constant 0 : index
    %19 = vector.load %arg9[%c0_11, %c0_12] : memref<128x384xbf16, #tpu.memory_space<vmem>>, vector<128x384xbf16>
    %cst_13 = arith.constant dense<0.000000e+00> : vector<16x384xf32>
    %20 = tpu.matmul %18, %19, %cst_13 {dimension_numbers = #tpu.dot_dimension_numbers<[1], [0], [0], [1], [0, 0, 1, 1], [], []>} : vector<16x128xbf16>, vector<128x384xbf16>, vector<16x384xf32> -> vector<16x384xf32>
    %c0_14 = arith.constant 0 : index
    %c0_15 = arith.constant 0 : index
    %21 = vector.load %arg10[%c0_14, %c0_15] : memref<1x384xf32, #tpu.memory_space<vmem>>, vector<1x384xf32>
    %22 = vector.broadcast %21 : vector<1x384xf32> to vector<16x384xf32>
    %23 = arith.addf %20, %22 : vector<16x384xf32>
    %24 = vector.extract_strided_slice %23 {offsets = [0, 0], sizes = [16, 128], strides = [1, 1]} : vector<16x384xf32> to vector<16x128xf32>
    %cst_16 = arith.constant 0.353553385 : f32
    %25 = vector.broadcast %cst_16 : f32 to vector<16x128xf32>
    %26 = arith.mulf %24, %25 : vector<16x128xf32>
    %27 = vector.shape_cast %26 : vector<16x128xf32> to vector<1x16x128xf32>
    %28 = vector.extract_strided_slice %23 {offsets = [0, 128], sizes = [16, 128], strides = [1, 1]} : vector<16x384xf32> to vector<16x128xf32>
    %29 = vector.shape_cast %28 : vector<16x128xf32> to vector<1x16x128xf32>
    %30 = vector.extract_strided_slice %23 {offsets = [0, 256], sizes = [16, 128], strides = [1, 1]} : vector<16x384xf32> to vector<16x128xf32>
    %31 = vector.shape_cast %30 : vector<16x128xf32> to vector<1x16x128xf32>
    %32 = arith.truncf %29 : vector<1x16x128xf32> to vector<1x16x128xbf16>
    %33 = tpu.iota {dimensions = array<i32: 2>} : vector<1x1x128xi32>
    %cst_17 = arith.constant 0.000000e+00 : f32
    %34 = vector.broadcast %cst_17 : f32 to vector<1x16x128xf32>
    %c0_i32 = arith.constant 0 : i32
    %c8_i32 = arith.constant 8 : i32
    %35 = arith.muli %c0_i32, %c8_i32 : i32
    %36 = vector.broadcast %35 : i32 to vector<1x1x128xi32>
    %37 = arith.cmpi sge, %33, %36 : vector<1x1x128xi32>
    %c8_i32_18 = arith.constant 8 : i32
    %38 = arith.addi %35, %c8_i32_18 : i32
    %39 = vector.broadcast %38 : i32 to vector<1x1x128xi32>
    %40 = arith.cmpi slt, %33, %39 : vector<1x1x128xi32>
    %41 = arith.andi %37, %40 : vector<1x1x128xi1>
    %cst_19 = arith.constant 1.000000e+00 : f32
    %cst_20 = arith.constant 0.000000e+00 : f32
    %42 = vector.broadcast %cst_19 : f32 to vector<1x1x128xf32>
    %43 = vector.broadcast %cst_20 : f32 to vector<1x1x128xf32>
    %44 = arith.select %41, %42, %43 : vector<1x1x128xi1>, vector<1x1x128xf32>
    %45 = vector.broadcast %44 : vector<1x1x128xf32> to vector<1x16x128xf32>
    %46 = arith.mulf %27, %45 : vector<1x16x128xf32>
    %47 = arith.truncf %46 : vector<1x16x128xf32> to vector<1x16x128xbf16>
    "tpu.trace_start"() <{level = 10 : i32, message = "bqc,bkc->bqk"}> : () -> ()
    %cst_21 = arith.constant dense<0.000000e+00> : vector<1x16x16xf32>
    %48 = tpu.matmul %47, %32, %cst_21 {dimension_numbers = #tpu.dot_dimension_numbers<[2], [2], [1], [1], [0, 0, 0, 1, 1, 1], [0], [0]>} : vector<1x16x128xbf16>, vector<1x16x128xbf16>, vector<1x16x16xf32> -> vector<1x16x16xf32>
    "tpu.trace_stop"() : () -> ()
    %cst_22 = arith.constant dense<0xFF800000> : vector<1x16xf32>
    %49 = vector.multi_reduction <maximumf>, %48, %cst_22 [2] : vector<1x16x16xf32> to vector<1x16xf32>
    %50 = vector.shape_cast %49 : vector<1x16xf32> to vector<1x16x1xf32>
    %51 = vector.broadcast %50 : vector<1x16x1xf32> to vector<1x16x16xf32>
    %52 = arith.subf %48, %51 : vector<1x16x16xf32>
    %53 = math.exp %52 : vector<1x16x16xf32>
    %cst_23 = arith.constant dense<0.000000e+00> : vector<1x16xf32>
    %54 = vector.multi_reduction <add>, %53, %cst_23 [2] : vector<1x16x16xf32> to vector<1x16xf32>
    %55 = vector.shape_cast %54 : vector<1x16xf32> to vector<1x16x1xf32>
    %56 = tpu.reciprocal %55 {approx = true} : vector<1x16x1xf32> -> vector<1x16x1xf32>
    %57 = vector.broadcast %56 : vector<1x16x1xf32> to vector<1x16x16xf32>
    %58 = arith.mulf %53, %57 : vector<1x16x16xf32>
    %59 = vector.broadcast %44 : vector<1x1x128xf32> to vector<1x16x128xf32>
    %60 = arith.mulf %31, %59 : vector<1x16x128xf32>
    %61 = arith.truncf %60 : vector<1x16x128xf32> to vector<1x16x128xbf16>
    %62 = arith.truncf %58 : vector<1x16x16xf32> to vector<1x16x16xbf16>
    "tpu.trace_start"() <{level = 10 : i32, message = "bqk,bkc->bqc"}> : () -> ()
    %cst_24 = arith.constant dense<0.000000e+00> : vector<1x16x128xf32>
    %63 = tpu.matmul %62, %61, %cst_24 {dimension_numbers = #tpu.dot_dimension_numbers<[2], [1], [1], [2], [0, 0, 0, 1, 1, 2], [0], [0]>} : vector<1x16x16xbf16>, vector<1x16x128xbf16>, vector<1x16x128xf32> -> vector<1x16x128xf32>
    "tpu.trace_stop"() : () -> ()
    %64 = arith.addf %34, %63 : vector<1x16x128xf32>
    %c1_i32 = arith.constant 1 : i32
    %c8_i32_25 = arith.constant 8 : i32
    %65 = arith.muli %c1_i32, %c8_i32_25 : i32
    %66 = vector.broadcast %65 : i32 to vector<1x1x128xi32>
    %67 = arith.cmpi sge, %33, %66 : vector<1x1x128xi32>
    %c8_i32_26 = arith.constant 8 : i32
    %68 = arith.addi %65, %c8_i32_26 : i32
    %69 = vector.broadcast %68 : i32 to vector<1x1x128xi32>
    %70 = arith.cmpi slt, %33, %69 : vector<1x1x128xi32>
    %71 = arith.andi %67, %70 : vector<1x1x128xi1>
    %cst_27 = arith.constant 1.000000e+00 : f32
    %cst_28 = arith.constant 0.000000e+00 : f32
    %72 = vector.broadcast %cst_27 : f32 to vector<1x1x128xf32>
    %73 = vector.broadcast %cst_28 : f32 to vector<1x1x128xf32>
    %74 = arith.select %71, %72, %73 : vector<1x1x128xi1>, vector<1x1x128xf32>
    %75 = vector.broadcast %74 : vector<1x1x128xf32> to vector<1x16x128xf32>
    %76 = arith.mulf %27, %75 : vector<1x16x128xf32>
    %77 = arith.truncf %76 : vector<1x16x128xf32> to vector<1x16x128xbf16>
    "tpu.trace_start"() <{level = 10 : i32, message = "bqc,bkc->bqk"}> : () -> ()
    %cst_29 = arith.constant dense<0.000000e+00> : vector<1x16x16xf32>
    %78 = tpu.matmul %77, %32, %cst_29 {dimension_numbers = #tpu.dot_dimension_numbers<[2], [2], [1], [1], [0, 0, 0, 1, 1, 1], [0], [0]>} : vector<1x16x128xbf16>, vector<1x16x128xbf16>, vector<1x16x16xf32> -> vector<1x16x16xf32>
    "tpu.trace_stop"() : () -> ()
    %cst_30 = arith.constant dense<0xFF800000> : vector<1x16xf32>
    %79 = vector.multi_reduction <maximumf>, %78, %cst_30 [2] : vector<1x16x16xf32> to vector<1x16xf32>
    %80 = vector.shape_cast %79 : vector<1x16xf32> to vector<1x16x1xf32>
    %81 = vector.broadcast %80 : vector<1x16x1xf32> to vector<1x16x16xf32>
    %82 = arith.subf %78, %81 : vector<1x16x16xf32>
    %83 = math.exp %82 : vector<1x16x16xf32>
    %cst_31 = arith.constant dense<0.000000e+00> : vector<1x16xf32>
    %84 = vector.multi_reduction <add>, %83, %cst_31 [2] : vector<1x16x16xf32> to vector<1x16xf32>
    %85 = vector.shape_cast %84 : vector<1x16xf32> to vector<1x16x1xf32>
    %86 = tpu.reciprocal %85 {approx = true} : vector<1x16x1xf32> -> vector<1x16x1xf32>
    %87 = vector.broadcast %86 : vector<1x16x1xf32> to vector<1x16x16xf32>
    %88 = arith.mulf %83, %87 : vector<1x16x16xf32>
    %89 = vector.broadcast %74 : vector<1x1x128xf32> to vector<1x16x128xf32>
    %90 = arith.mulf %31, %89 : vector<1x16x128xf32>
    %91 = arith.truncf %90 : vector<1x16x128xf32> to vector<1x16x128xbf16>
    %92 = arith.truncf %88 : vector<1x16x16xf32> to vector<1x16x16xbf16>
    "tpu.trace_start"() <{level = 10 : i32, message = "bqk,bkc->bqc"}> : () -> ()
    %cst_32 = arith.constant dense<0.000000e+00> : vector<1x16x128xf32>
    %93 = tpu.matmul %92, %91, %cst_32 {dimension_numbers = #tpu.dot_dimension_numbers<[2], [1], [1], [2], [0, 0, 0, 1, 1, 2], [0], [0]>} : vector<1x16x16xbf16>, vector<1x16x128xbf16>, vector<1x16x128xf32> -> vector<1x16x128xf32>
    "tpu.trace_stop"() : () -> ()
    %94 = arith.addf %64, %93 : vector<1x16x128xf32>
    %c2_i32 = arith.constant 2 : i32
    %c8_i32_33 = arith.constant 8 : i32
    %95 = arith.muli %c2_i32, %c8_i32_33 : i32
    %96 = vector.broadcast %95 : i32 to vector<1x1x128xi32>
    %97 = arith.cmpi sge, %33, %96 : vector<1x1x128xi32>
    %c8_i32_34 = arith.constant 8 : i32
    %98 = arith.addi %95, %c8_i32_34 : i32
    %99 = vector.broadcast %98 : i32 to vector<1x1x128xi32>
    %100 = arith.cmpi slt, %33, %99 : vector<1x1x128xi32>
    %101 = arith.andi %97, %100 : vector<1x1x128xi1>
    %cst_35 = arith.constant 1.000000e+00 : f32
    %cst_36 = arith.constant 0.000000e+00 : f32
    %102 = vector.broadcast %cst_35 : f32 to vector<1x1x128xf32>
    %103 = vector.broadcast %cst_36 : f32 to vector<1x1x128xf32>
    %104 = arith.select %101, %102, %103 : vector<1x1x128xi1>, vector<1x1x128xf32>
    %105 = vector.broadcast %104 : vector<1x1x128xf32> to vector<1x16x128xf32>
    %106 = arith.mulf %27, %105 : vector<1x16x128xf32>
    %107 = arith.truncf %106 : vector<1x16x128xf32> to vector<1x16x128xbf16>
    "tpu.trace_start"() <{level = 10 : i32, message = "bqc,bkc->bqk"}> : () -> ()
    %cst_37 = arith.constant dense<0.000000e+00> : vector<1x16x16xf32>
    %108 = tpu.matmul %107, %32, %cst_37 {dimension_numbers = #tpu.dot_dimension_numbers<[2], [2], [1], [1], [0, 0, 0, 1, 1, 1], [0], [0]>} : vector<1x16x128xbf16>, vector<1x16x128xbf16>, vector<1x16x16xf32> -> vector<1x16x16xf32>
    "tpu.trace_stop"() : () -> ()
    %cst_38 = arith.constant dense<0xFF800000> : vector<1x16xf32>
    %109 = vector.multi_reduction <maximumf>, %108, %cst_38 [2] : vector<1x16x16xf32> to vector<1x16xf32>
    %110 = vector.shape_cast %109 : vector<1x16xf32> to vector<1x16x1xf32>
    %111 = vector.broadcast %110 : vector<1x16x1xf32> to vector<1x16x16xf32>
    %112 = arith.subf %108, %111 : vector<1x16x16xf32>
    %113 = math.exp %112 : vector<1x16x16xf32>
    %cst_39 = arith.constant dense<0.000000e+00> : vector<1x16xf32>
    %114 = vector.multi_reduction <add>, %113, %cst_39 [2] : vector<1x16x16xf32> to vector<1x16xf32>
    %115 = vector.shape_cast %114 : vector<1x16xf32> to vector<1x16x1xf32>
    %116 = tpu.reciprocal %115 {approx = true} : vector<1x16x1xf32> -> vector<1x16x1xf32>
    %117 = vector.broadcast %116 : vector<1x16x1xf32> to vector<1x16x16xf32>
    %118 = arith.mulf %113, %117 : vector<1x16x16xf32>
    %119 = vector.broadcast %104 : vector<1x1x128xf32> to vector<1x16x128xf32>
    %120 = arith.mulf %31, %119 : vector<1x16x128xf32>
    %121 = arith.truncf %120 : vector<1x16x128xf32> to vector<1x16x128xbf16>
    %122 = arith.truncf %118 : vector<1x16x16xf32> to vector<1x16x16xbf16>
    "tpu.trace_start"() <{level = 10 : i32, message = "bqk,bkc->bqc"}> : () -> ()
    %cst_40 = arith.constant dense<0.000000e+00> : vector<1x16x128xf32>
    %123 = tpu.matmul %122, %121, %cst_40 {dimension_numbers = #tpu.dot_dimension_numbers<[2], [1], [1], [2], [0, 0, 0, 1, 1, 2], [0], [0]>} : vector<1x16x16xbf16>, vector<1x16x128xbf16>, vector<1x16x128xf32> -> vector<1x16x128xf32>
    "tpu.trace_stop"() : () -> ()
    %124 = arith.addf %94, %123 : vector<1x16x128xf32>
    %c3_i32 = arith.constant 3 : i32
    %c8_i32_41 = arith.constant 8 : i32
    %125 = arith.muli %c3_i32, %c8_i32_41 : i32
    %126 = vector.broadcast %125 : i32 to vector<1x1x128xi32>
    %127 = arith.cmpi sge, %33, %126 : vector<1x1x128xi32>
    %c8_i32_42 = arith.constant 8 : i32
    %128 = arith.addi %125, %c8_i32_42 : i32
    %129 = vector.broadcast %128 : i32 to vector<1x1x128xi32>
    %130 = arith.cmpi slt, %33, %129 : vector<1x1x128xi32>
    %131 = arith.andi %127, %130 : vector<1x1x128xi1>
    %cst_43 = arith.constant 1.000000e+00 : f32
    %cst_44 = arith.constant 0.000000e+00 : f32
    %132 = vector.broadcast %cst_43 : f32 to vector<1x1x128xf32>
    %133 = vector.broadcast %cst_44 : f32 to vector<1x1x128xf32>
    %134 = arith.select %131, %132, %133 : vector<1x1x128xi1>, vector<1x1x128xf32>
    %135 = vector.broadcast %134 : vector<1x1x128xf32> to vector<1x16x128xf32>
    %136 = arith.mulf %27, %135 : vector<1x16x128xf32>
    %137 = arith.truncf %136 : vector<1x16x128xf32> to vector<1x16x128xbf16>
    "tpu.trace_start"() <{level = 10 : i32, message = "bqc,bkc->bqk"}> : () -> ()
    %cst_45 = arith.constant dense<0.000000e+00> : vector<1x16x16xf32>
    %138 = tpu.matmul %137, %32, %cst_45 {dimension_numbers = #tpu.dot_dimension_numbers<[2], [2], [1], [1], [0, 0, 0, 1, 1, 1], [0], [0]>} : vector<1x16x128xbf16>, vector<1x16x128xbf16>, vector<1x16x16xf32> -> vector<1x16x16xf32>
    "tpu.trace_stop"() : () -> ()
    %cst_46 = arith.constant dense<0xFF800000> : vector<1x16xf32>
    %139 = vector.multi_reduction <maximumf>, %138, %cst_46 [2] : vector<1x16x16xf32> to vector<1x16xf32>
    %140 = vector.shape_cast %139 : vector<1x16xf32> to vector<1x16x1xf32>
    %141 = vector.broadcast %140 : vector<1x16x1xf32> to vector<1x16x16xf32>
    %142 = arith.subf %138, %141 : vector<1x16x16xf32>
    %143 = math.exp %142 : vector<1x16x16xf32>
    %cst_47 = arith.constant dense<0.000000e+00> : vector<1x16xf32>
    %144 = vector.multi_reduction <add>, %143, %cst_47 [2] : vector<1x16x16xf32> to vector<1x16xf32>
    %145 = vector.shape_cast %144 : vector<1x16xf32> to vector<1x16x1xf32>
    %146 = tpu.reciprocal %145 {approx = true} : vector<1x16x1xf32> -> vector<1x16x1xf32>
    %147 = vector.broadcast %146 : vector<1x16x1xf32> to vector<1x16x16xf32>
    %148 = arith.mulf %143, %147 : vector<1x16x16xf32>
    %149 = vector.broadcast %134 : vector<1x1x128xf32> to vector<1x16x128xf32>
    %150 = arith.mulf %31, %149 : vector<1x16x128xf32>
    %151 = arith.truncf %150 : vector<1x16x128xf32> to vector<1x16x128xbf16>
    %152 = arith.truncf %148 : vector<1x16x16xf32> to vector<1x16x16xbf16>
    "tpu.trace_start"() <{level = 10 : i32, message = "bqk,bkc->bqc"}> : () -> ()
    %cst_48 = arith.constant dense<0.000000e+00> : vector<1x16x128xf32>
    %153 = tpu.matmul %152, %151, %cst_48 {dimension_numbers = #tpu.dot_dimension_numbers<[2], [1], [1], [2], [0, 0, 0, 1, 1, 2], [0], [0]>} : vector<1x16x16xbf16>, vector<1x16x128xbf16>, vector<1x16x128xf32> -> vector<1x16x128xf32>
    "tpu.trace_stop"() : () -> ()
    %154 = arith.addf %124, %153 : vector<1x16x128xf32>
    %c4_i32 = arith.constant 4 : i32
    %155 = vector.shape_cast %154 : vector<1x16x128xf32> to vector<16x128xf32>
    %156 = arith.truncf %155 : vector<16x128xf32> to vector<16x128xbf16>
    %c0_49 = arith.constant 0 : index
    %c0_50 = arith.constant 0 : index
    %157 = vector.load %arg11[%c0_49, %c0_50] : memref<128x128xbf16, #tpu.memory_space<vmem>>, vector<128x128xbf16>
    %cst_51 = arith.constant dense<0.000000e+00> : vector<16x128xf32>
    %158 = tpu.matmul %156, %157, %cst_51 {dimension_numbers = #tpu.dot_dimension_numbers<[1], [0], [0], [1], [0, 0, 1, 1], [], []>} : vector<16x128xbf16>, vector<128x128xbf16>, vector<16x128xf32> -> vector<16x128xf32>
    %c0_52 = arith.constant 0 : index
    %c0_53 = arith.constant 0 : index
    %159 = vector.load %arg12[%c0_52, %c0_53] : memref<1x128xf32, #tpu.memory_space<vmem>>, vector<1x128xf32>
    %160 = vector.broadcast %159 : vector<1x128xf32> to vector<16x128xf32>
    %161 = arith.addf %158, %160 : vector<16x128xf32>
    %162 = arith.addf %161, %17 : vector<16x128xf32>
    %163 = arith.truncf %162 : vector<16x128xf32> to vector<16x128xbf16>
    %c0_54 = arith.constant 0 : index
    %c0_55 = arith.constant 0 : index
    %164 = vector.load %arg13[%c0_54, %c0_55] : memref<128x128xbf16, #tpu.memory_space<vmem>>, vector<128x128xbf16>
    %cst_56 = arith.constant dense<0.000000e+00> : vector<16x128xf32>
    %165 = tpu.matmul %163, %164, %cst_56 {dimension_numbers = #tpu.dot_dimension_numbers<[1], [0], [0], [1], [0, 0, 1, 1], [], []>} : vector<16x128xbf16>, vector<128x128xbf16>, vector<16x128xf32> -> vector<16x128xf32>
    %166 = arith.addf %165, %162 : vector<16x128xf32>
    %167 = vector.shape_cast %166 : vector<16x128xf32> to vector<1x16x128xf32>
    %cst_57 = arith.constant dense<0.000000e+00> : vector<1x128xf32>
    %168 = vector.multi_reduction <add>, %167, %cst_57 [1] : vector<1x16x128xf32> to vector<1x128xf32>
    %cst_58 = arith.constant 1.600000e+01 : f32
    %169 = vector.broadcast %cst_58 : f32 to vector<1x128xf32>
    %170 = arith.divf %168, %169 : vector<1x128xf32>
    %171 = arith.truncf %170 : vector<1x128xf32> to vector<1x128xbf16>
    %c0_59 = arith.constant 0 : index
    %c0_60 = arith.constant 0 : index
    %172 = vector.load %arg14[%c0_59, %c0_60] : memref<128x128xbf16, #tpu.memory_space<vmem>>, vector<128x128xbf16>
    %cst_61 = arith.constant dense<0.000000e+00> : vector<1x128xf32>
    %173 = tpu.matmul %171, %172, %cst_61 {dimension_numbers = #tpu.dot_dimension_numbers<[1], [0], [0], [1], [0, 0, 1, 1], [], []>} : vector<1x128xbf16>, vector<128x128xbf16>, vector<1x128xf32> -> vector<1x128xf32>
    %c0_62 = arith.constant 0 : index
    %c0_63 = arith.constant 0 : index
    %174 = vector.load %arg15[%c0_62, %c0_63] : memref<1x128xf32, #tpu.memory_space<vmem>>, vector<1x128xf32>
    %175 = arith.addf %173, %174 : vector<1x128xf32>
    %cst_64 = arith.constant 0.000000e+00 : f32
    %176 = vector.broadcast %cst_64 : f32 to vector<1x128xf32>
    %177 = arith.maximumf %175, %176 : vector<1x128xf32>
    %178 = arith.truncf %177 : vector<1x128xf32> to vector<1x128xbf16>
    %c0_65 = arith.constant 0 : index
    %c0_66 = arith.constant 0 : index
    %179 = vector.load %arg16[%c0_65, %c0_66] : memref<128x128xbf16, #tpu.memory_space<vmem>>, vector<128x128xbf16>
    %cst_67 = arith.constant dense<0.000000e+00> : vector<1x128xf32>
    %180 = tpu.matmul %178, %179, %cst_67 {dimension_numbers = #tpu.dot_dimension_numbers<[1], [0], [0], [1], [0, 0, 1, 1], [], []>} : vector<1x128xbf16>, vector<128x128xbf16>, vector<1x128xf32> -> vector<1x128xf32>
    %c0_68 = arith.constant 0 : index
    %c0_69 = arith.constant 0 : index
    %181 = vector.load %arg17[%c0_68, %c0_69] : memref<1x128xf32, #tpu.memory_space<vmem>>, vector<1x128xf32>
    %182 = arith.addf %180, %181 : vector<1x128xf32>
    %183 = arith.negf %182 : vector<1x128xf32>
    %184 = math.exp %183 : vector<1x128xf32>
    %cst_70 = arith.constant 1.000000e+00 : f32
    %185 = vector.broadcast %cst_70 : f32 to vector<1x128xf32>
    %186 = arith.addf %185, %184 : vector<1x128xf32>
    %187 = arith.divf %185, %186 : vector<1x128xf32>
    %c0_71 = arith.constant 0 : index
    %c0_72 = arith.constant 0 : index
    %c0_73 = arith.constant 0 : index
    %188 = vector.load %arg2[%c0_71, %c0_72, %c0_73] : memref<1x16x128xbf16, #tpu.memory_space<vmem>>, vector<1x16x128xbf16>
    %189 = arith.extf %188 : vector<1x16x128xbf16> to vector<1x16x128xf32>
    %c0_74 = arith.constant 0 : index
    %c0_75 = arith.constant 0 : index
    %190 = vector.load %arg5[%c0_74, %c0_75] : memref<1x128xf32, #tpu.memory_space<vmem>>, vector<1x128xf32>
    %191 = vector.shape_cast %190 : vector<1x128xf32> to vector<1x1x128xf32>
    %192 = vector.broadcast %191 : vector<1x1x128xf32> to vector<1x16x128xf32>
    %193 = arith.mulf %189, %192 : vector<1x16x128xf32>
    %c0_76 = arith.constant 0 : index
    %c0_77 = arith.constant 0 : index
    %194 = vector.load %arg6[%c0_76, %c0_77] : memref<1x128xf32, #tpu.memory_space<vmem>>, vector<1x128xf32>
    %195 = vector.shape_cast %194 : vector<1x128xf32> to vector<1x1x128xf32>
    %196 = vector.broadcast %195 : vector<1x1x128xf32> to vector<1x16x128xf32>
    %197 = arith.addf %193, %196 : vector<1x16x128xf32>
    %198 = vector.shape_cast %187 : vector<1x128xf32> to vector<1x1x128xf32>
    %199 = vector.broadcast %198 : vector<1x1x128xf32> to vector<1x16x128xf32>
    %200 = arith.mulf %167, %199 : vector<1x16x128xf32>
    %201 = arith.addf %200, %197 : vector<1x16x128xf32>
    %cst_78 = arith.constant 0.000000e+00 : f32
    %202 = vector.broadcast %cst_78 : f32 to vector<1x16x128xf32>
    %203 = arith.maximumf %201, %202 : vector<1x16x128xf32>
    %c0_79 = arith.constant 0 : index
    %c0_80 = arith.constant 0 : index
    %c0_81 = arith.constant 0 : index
    %204 = vector.load %arg18[%c0_79, %c0_80, %c0_81] : memref<1x16x128xf32, #tpu.memory_space<vmem>>, vector<1x16x128xf32>
    tpu.vector_store %arg18[%c0_79, %c0_80, %c0_81], %203 {strides = array<i32>} : memref<1x16x128xf32, #tpu.memory_space<vmem>>, vector<1x16x128xf32>,
    return
  }
  func.func @transform_0(%arg0: i32) -> (i32, i32, i32) {
    %c0_i32 = arith.constant 0 : i32
    %c0_i32_0 = arith.constant 0 : i32
    %c0_i32_1 = arith.constant 0 : i32
    return %arg0, %c0_i32, %c0_i32_0 : i32, i32, i32
  }
  func.func @transform_1(%arg0: i32) -> (i32, i32, i32) {
    %c0_i32 = arith.constant 0 : i32
    %c0_i32_0 = arith.constant 0 : i32
    %c0_i32_1 = arith.constant 0 : i32
    return %arg0, %c0_i32, %c0_i32_0 : i32, i32, i32
  }
  func.func @transform_2(%arg0: i32) -> (i32, i32) {
    %c0_i32 = arith.constant 0 : i32
    %c0_i32_0 = arith.constant 0 : i32
    %c0_i32_1 = arith.constant 0 : i32
    return %c0_i32, %c0_i32_0 : i32, i32
  }
  func.func @transform_3(%arg0: i32) -> (i32, i32) {
    %c0_i32 = arith.constant 0 : i32
    %c0_i32_0 = arith.constant 0 : i32
    %c0_i32_1 = arith.constant 0 : i32
    return %c0_i32, %c0_i32_0 : i32, i32
  }
  func.func @transform_4(%arg0: i32) -> (i32, i32) {
    %c0_i32 = arith.constant 0 : i32
    %c0_i32_0 = arith.constant 0 : i32
    %c0_i32_1 = arith.constant 0 : i32
    return %c0_i32, %c0_i32_0 : i32, i32
  }
  func.func @transform_5(%arg0: i32) -> (i32, i32) {
    %c0_i32 = arith.constant 0 : i32
    %c0_i32_0 = arith.constant 0 : i32
    %c0_i32_1 = arith.constant 0 : i32
    return %c0_i32, %c0_i32_0 : i32, i32
  }
  func.func @transform_6(%arg0: i32) -> (i32, i32) {
    %c0_i32 = arith.constant 0 : i32
    %c0_i32_0 = arith.constant 0 : i32
    %c0_i32_1 = arith.constant 0 : i32
    return %c0_i32, %c0_i32_0 : i32, i32
  }
  func.func @transform_7(%arg0: i32) -> (i32, i32) {
    %c0_i32 = arith.constant 0 : i32
    %c0_i32_0 = arith.constant 0 : i32
    %c0_i32_1 = arith.constant 0 : i32
    return %c0_i32, %c0_i32_0 : i32, i32
  }
  func.func @transform_8(%arg0: i32) -> (i32, i32) {
    %c0_i32 = arith.constant 0 : i32
    %c0_i32_0 = arith.constant 0 : i32
    %c0_i32_1 = arith.constant 0 : i32
    return %c0_i32, %c0_i32_0 : i32, i32
  }
  func.func @transform_9(%arg0: i32) -> (i32, i32) {
    %c0_i32 = arith.constant 0 : i32
    %c0_i32_0 = arith.constant 0 : i32
    %c0_i32_1 = arith.constant 0 : i32
    return %c0_i32, %c0_i32_0 : i32, i32
  }
  func.func @transform_10(%arg0: i32) -> (i32, i32) {
    %c0_i32 = arith.constant 0 : i32
    %c0_i32_0 = arith.constant 0 : i32
    %c0_i32_1 = arith.constant 0 : i32
    return %c0_i32, %c0_i32_0 : i32, i32
  }
  func.func @transform_11(%arg0: i32) -> (i32, i32) {
    %c0_i32 = arith.constant 0 : i32
    %c0_i32_0 = arith.constant 0 : i32
    %c0_i32_1 = arith.constant 0 : i32
    return %c0_i32, %c0_i32_0 : i32, i32
  }
  func.func @transform_12(%arg0: i32) -> (i32, i32) {
    %c0_i32 = arith.constant 0 : i32
    %c0_i32_0 = arith.constant 0 : i32
    %c0_i32_1 = arith.constant 0 : i32
    return %c0_i32, %c0_i32_0 : i32, i32
  }
  func.func @transform_13(%arg0: i32) -> (i32, i32) {
    %c0_i32 = arith.constant 0 : i32
    %c0_i32_0 = arith.constant 0 : i32
    %c0_i32_1 = arith.constant 0 : i32
    return %c0_i32, %c0_i32_0 : i32, i32
  }
  func.func @transform_14(%arg0: i32) -> (i32, i32) {
    %c0_i32 = arith.constant 0 : i32
    %c0_i32_0 = arith.constant 0 : i32
    %c0_i32_1 = arith.constant 0 : i32
    return %c0_i32, %c0_i32_0 : i32, i32
  }
  func.func @transform_15(%arg0: i32) -> (i32, i32) {
    %c0_i32 = arith.constant 0 : i32
    %c0_i32_0 = arith.constant 0 : i32
    %c0_i32_1 = arith.constant 0 : i32
    return %c0_i32, %c0_i32_0 : i32, i32
  }
  func.func @transform_16(%arg0: i32) -> (i32, i32) {
    %c0_i32 = arith.constant 0 : i32
    %c0_i32_0 = arith.constant 0 : i32
    %c0_i32_1 = arith.constant 0 : i32
    return %c0_i32, %c0_i32_0 : i32, i32
  }
  func.func @transform_17(%arg0: i32) -> (i32, i32, i32) {
    %c0_i32 = arith.constant 0 : i32
    %c0_i32_0 = arith.constant 0 : i32
    %c0_i32_1 = arith.constant 0 : i32
    return %arg0, %c0_i32, %c0_i32_0 : i32, i32, i32
  }
}

</mosaic_0001>

<bundles_post_ra>
// kernel: forward.4
= control target key start
LH: loop header
LB: loop body
LE: loop exit
PB: predicated region body
PF: predicated region fallthrough
CT: control target
= control target key end

     0   :  { %vm47_vm0 = vcmask 130048   ;;  %s269_s1 = inlined_call_operand.vmem [shape: bf16[16,128], index: 1, kind: input, shape index: {}]   ;;  %s270_s0 = inlined_call_operand.vmem [shape: bf16[32,16], index: 0, kind: input, shape index: {}]   ;;  %s271_s2 = inlined_call_operand.vmem [shape: f32[1,128], index: 2, kind: input, shape index: {}]   ;;  %s272_s3 = inlined_call_operand.vmem [shape: bf16[32,128], index: 3, kind: output, shape index: {0}]   ;;  %s273_s4 = inlined_call_operand.vmem [shape: f32[1,1,128], index: 4, kind: output, shape index: {1}]   ;;  %s274_s5 = inlined_call_operand.vmem [shape: f32[1,1,128], index: 5, kind: output, shape index: {2}]  }
   0x1   :  { %v212_v0 = vld [vmem:[%s269_s1] sm:$0xff]   ;;  %v214_v2 = vld [vmem:[%s270_s0 + $0x8] sm:$0xff]  }
   0x2   :  { %v213_v1 = vld [vmem:[%s270_s0] sm:$0xff]   ;;  %206 = vmatprep.subr.bf16.mxu0 %v212_v0 }
   0x3   :  { %207 = vmatpush3.bf16.msra.mxu0 %v212_v0  ;;  %208 = vmatprep.mubr.msk.bf16.mxu0 %vm47_vm0, %v213_v1  ;;  %v178_v4 = vld [vmem:[%s271_s2] ss:$0 sm:$0xff] }
   0x6   :  { %209 = vmatmul.mubr.msk.bf16.vlgmr.msra.gmra.mxu0 %vm47_vm0, %v214_v2 }
  0xc6   :  { %v210_v3 = vpop.f32.mrf.mxu0 }
  0xc7   :  { %v97_v7 = vadd.f32 %v210_v3, %v178_v4 }
  0xc8   :  { %v88_v5 = vpop.f32.mrf.mxu0 }
  0xc9   :  { %v89_v8 = vadd.f32 %v178_v4, %v88_v5  ;;  %v154_v17 = vmul.f32 %v97_v7, %v97_v7 }
  0xca   :  { %v211_v6 = vpop.f32.mrf.mxu0 }
  0xcb   :  { %v100_v9 = vadd.f32 %v211_v6, %v178_v4  ;;  %v152_v13 = vmul.f32 %v89_v8, %v89_v8 }
  0xcc   :  { %v91_v10 = vpop.f32.mrf.mxu0 }
  0xcd   :  { %v200_v11 = vpack.c.bf16 %v100_v9, %v97_v7  ;;  %v92_v12 = vadd.f32 %v178_v4, %v91_v10  ;;  %v155_v20 = vmul.f32 %v100_v9, %v100_v9 }
  0xcf   :  { %202 = vst [vmem:[%s272_s3 + $0x8] sm:$0xff] %v200_v11   ;;  %v195_v14 = vpack.c.bf16 %v92_v12, %v89_v8  ;;  %v142_v15 = vadd.f32 %v92_v12, %v89_v8  ;;  %v153_v16 = vmul.f32 %v92_v12, %v92_v12 }
  0xd1   :  { %196 = vst [vmem:[%s272_s3] sm:$0xff] %v195_v14   ;;  %v143_v18 = vadd.f32 %v142_v15, %v97_v7  ;;  %v156_v19 = vadd.f32 %v153_v16, %v152_v13 }
  0xd3   :  { %v144_v21 = vadd.f32 %v143_v18, %v100_v9  ;;  %v157_v22 = vadd.f32 %v156_v19, %v154_v17 }
  0xd5   :  { %v145_v23 = vrot.slane %v144_v21, 4  ;;  %v158_v24 = vadd.f32 %v157_v22, %v155_v20 }
  0xd7   :  { %v146_v25 = vadd.f32 %v145_v23, %v144_v21  ;;  %v159_v26 = vrot.slane %v158_v24, 4 }
  0xd9   :  { %v147_v27 = vrot.slane %v146_v25, 2  ;;  %v160_v28 = vadd.f32 %v159_v26, %v158_v24 }
  0xdb   :  { %v148_v29 = vadd.f32 %v147_v27, %v146_v25  ;;  %v161_v30 = vrot.slane %v160_v28, 2 }
  0xdd   :  { %v149_v31 = vrot.slane %v148_v29, 1  ;;  %v162_v32 = vadd.f32 %v161_v30, %v160_v28 }
  0xdf   :  { %v150_v33 = vadd.f32 %v149_v31, %v148_v29  ;;  %v163_v34 = vrot.slane %v162_v32, 1 }
  0xe1   :  { %151 = vst [vmem:[%s273_s4] sm:$0x1] %v150_v33  ;;  %v164_v35 = vadd.f32 %v163_v34, %v162_v32 }
  0xe3   :  { %165 = vst [vmem:[%s274_s5] sm:$0x1] %v164_v35 }

// kernel: forward.3
= control target key start
LH: loop header
LB: loop body
LE: loop exit
PB: predicated region body
PF: predicated region fallthrough
CT: control target
= control target key end

     0   :  { %v319_v0 = vmov 0   ;;  %vm119_vm0 = vcmask 130048   ;;  %s404_s1 = inlined_call_operand.vmem [shape: bf16[144,128], index: 1, kind: input, shape index: {}]   ;;  %s405_s0 = inlined_call_operand.vmem [shape: bf16[32,144], index: 0, kind: input, shape index: {}]   ;;  %s406_s2 = inlined_call_operand.vmem [shape: f32[1,128], index: 2, kind: input, shape index: {}]   ;;  %s407_s3 = inlined_call_operand.vmem [shape: bf16[32,128], index: 3, kind: output, shape index: {0}]   ;;  %s408_s4 = inlined_call_operand.vmem [shape: f32[1,1,128], index: 4, kind: output, shape index: {1}]   ;;  %s409_s5 = inlined_call_operand.vmem [shape: f32[1,1,128], index: 5, kind: output, shape index: {2}]  }
   0x1   :  { %126 = vmatprep.subr.bf16.mxu0 %v319_v0  ;;  %285 = vmatprep.subr.bf16.mxu1 %v319_v0  ;;  %v304_v1 = vld [vmem:[%s404_s1 + $0x38] sm:$0xff]   ;;  %v305_v2 = vld [vmem:[%s404_s1 + $0x30] sm:$0xff]   ;;  %v306_v3 = vld [vmem:[%s404_s1 + $0x28] sm:$0xff]  }
   0x2   :  { %127 = vmatpush1.bf16.msra.mxu0 %v304_v1  ;;  %294 = vmatpush1.bf16.msra.mxu1 %v304_v1  ;;  %v307_v4 = vld [vmem:[%s404_s1 + $0x20] sm:$0xff]   ;;  %v318_v6 = vld [vmem:[%s405_s0 + $0x14] ss:$8 sps:$4 sm:$0xff]   ;;  %v310_v9 = vld [vmem:[%s404_s1 + $0x8] sm:$0xff]  }
   0x3   :  { %128 = vmatprep.subr.bf16.mxu0 %v319_v0  ;;  %286 = vmatprep.subr.bf16.mxu1 %v319_v0  ;;  %v315_v5 = vld [vmem:[%s405_s0 + $0x4] ss:$8 sps:$4 sm:$0xff]   ;;  %v308_v7 = vld [vmem:[%s404_s1 + $0x18] sm:$0xff]   ;;  %v309_v8 = vld [vmem:[%s404_s1 + $0x10] sm:$0xff]  }
   0x4   :  { %264 = vmatprep.mubr.msk.bf16.mxu0 %vm119_vm0, %v315_v5  ;;  %265 = vmatprep.mubr.msk.bf16.mxu1 %vm119_vm0, %v318_v6  ;;  %v311_v10 = vld [vmem:[%s404_s1] sm:$0xff]   ;;  %v316_v13 = vld [vmem:[%s405_s0 + $0x10] ss:$8 sps:$4 sm:$0xff]  }
   0x5   :  { %v312_v11 = vld [vmem:[%s404_s1 + $0x40] sm:$0xff]  }
   0x6   :  { %129 = vmatpush1.bf16.msra.mxu0 %v305_v2  ;;  %295 = vmatpush1.bf16.msra.mxu1 %v305_v2  ;;  %v313_v12 = vld [vmem:[%s405_s0] ss:$8 sps:$4 sm:$0xff]  }
   0x7   :  { %130 = vmatprep.subr.bf16.mxu0 %v319_v0  ;;  %287 = vmatprep.subr.bf16.mxu1 %v319_v0  ;;  %v250_v14 = vld [vmem:[%s406_s2] ss:$0 sm:$0xff] }
   0xa   :  { %131 = vmatpush1.bf16.msra.mxu0 %v306_v3  ;;  %296 = vmatpush1.bf16.msra.mxu1 %v306_v3 }
   0xb   :  { %132 = vmatprep.subr.bf16.mxu0 %v319_v0  ;;  %288 = vmatprep.subr.bf16.mxu1 %v319_v0 }
   0xe   :  { %133 = vmatpush1.bf16.msra.mxu0 %v307_v4  ;;  %297 = vmatpush1.bf16.msra.mxu1 %v307_v4 }
   0xf   :  { %134 = vmatprep.subr.bf16.mxu0 %v319_v0  ;;  %289 = vmatprep.subr.bf16.mxu1 %v319_v0 }
  0x12   :  { %135 = vmatpush1.bf16.msra.mxu0 %v308_v7  ;;  %298 = vmatpush1.bf16.msra.mxu1 %v308_v7 }
  0x13   :  { %136 = vmatprep.subr.bf16.mxu0 %v319_v0  ;;  %290 = vmatprep.subr.bf16.mxu1 %v319_v0 }
  0x16   :  { %137 = vmatpush1.bf16.msra.mxu0 %v309_v8  ;;  %299 = vmatpush1.bf16.msra.mxu1 %v309_v8 }
  0x17   :  { %138 = vmatprep.subr.bf16.mxu0 %v319_v0  ;;  %291 = vmatprep.subr.bf16.mxu1 %v319_v0 }
  0x1a   :  { %139 = vmatpush1.bf16.msra.mxu0 %v310_v9  ;;  %300 = vmatpush1.bf16.msra.mxu1 %v310_v9 }
  0x1b   :  { %140 = vmatprep.subr.bf16.mxu0 %v319_v0  ;;  %292 = vmatprep.subr.bf16.mxu1 %v319_v0 }
  0x1e   :  { %141 = vmatpush1.bf16.msra.mxu0 %v311_v10  ;;  %301 = vmatpush1.bf16.msra.mxu1 %v311_v10 }
  0x1f   :  { %156 = vmatprep.subr.bf16.mxu0 %v319_v0  ;;  %293 = vmatprep.subr.bf16.mxu1 %v319_v0 }
  0x22   :  { %157 = vmatpush2.bf16.msra.mxu0 %v312_v11  ;;  %302 = vmatpush2.bf16.msra.mxu1 %v312_v11 }
  0x25   :  { %159 = vmatmul.mubr.bf16.vlgmr.msra.gmra.mxu0 %v313_v12  ;;  %167 = vmatmul.mubr.bf16.vlgmr.msra.gmra.mxu1 %v316_v13 }
  0xe5   :  { %v160_v15 = vpop.f32.mrf.mxu0  ;;  %v168_v16 = vpop.f32.mrf.mxu1 }
  0xe6   :  { %v161_v17 = vadd.f32 %v250_v14, %v160_v15  ;;  %v169_v20 = vadd.f32 %v250_v14, %v168_v16 }
  0xe7   :  { %v162_v18 = vpop.f32.mrf.mxu0  ;;  %v170_v19 = vpop.f32.mrf.mxu1 }
  0xe8   :  { %v224_v25 = vmul.f32 %v161_v17, %v161_v17  ;;  %v226_v32 = vmul.f32 %v169_v20, %v169_v20 }
  0xe9   :  { %v163_v21 = vpop.f32.mrf.mxu0  ;;  %v171_v22 = vpop.f32.mrf.mxu1 }
  0xea   :  { %v164_v23 = vadd.f32 %v250_v14, %v163_v21  ;;  %v172_v24 = vadd.f32 %v250_v14, %v171_v22 }
  0xeb   :  { %v165_v26 = vpop.f32.mrf.mxu0  ;;  %v173_v27 = vpop.f32.mrf.mxu1 }
  0xec   :  { %v277_v28 = vpack.c.bf16 %v164_v23, %v161_v17  ;;  %v214_v29 = vadd.f32 %v164_v23, %v161_v17  ;;  %v225_v30 = vmul.f32 %v164_v23, %v164_v23  ;;  %v282_v31 = vpack.c.bf16 %v172_v24, %v169_v20 }
  0xed   :  { %v227_v36 = vmul.f32 %v172_v24, %v172_v24 }
  0xee   :  { %278 = vst [vmem:[%s407_s3] sm:$0xff] %v277_v28   ;;  %v228_v33 = vadd.f32 %v225_v30, %v224_v25  ;;  %284 = vst [vmem:[%s407_s3 + $0x8] sm:$0xff] %v282_v31   ;;  %v215_v34 = vadd.f32 %v214_v29, %v169_v20 }
  0xf0   :  { %v216_v35 = vadd.f32 %v215_v34, %v172_v24  ;;  %v229_v37 = vadd.f32 %v228_v33, %v226_v32 }
  0xf2   :  { %v217_v38 = vrot.slane %v216_v35, 4  ;;  %v230_v39 = vadd.f32 %v229_v37, %v227_v36 }
  0xf4   :  { %v218_v40 = vadd.f32 %v217_v38, %v216_v35  ;;  %v231_v41 = vrot.slane %v230_v39, 4 }
  0xf6   :  { %v219_v42 = vrot.slane %v218_v40, 2  ;;  %v232_v43 = vadd.f32 %v231_v41, %v230_v39 }
  0xf8   :  { %v220_v44 = vadd.f32 %v219_v42, %v218_v40  ;;  %v233_v45 = vrot.slane %v232_v43, 2 }
  0xfa   :  { %v221_v46 = vrot.slane %v220_v44, 1  ;;  %v234_v47 = vadd.f32 %v233_v45, %v232_v43 }
  0xfc   :  { %v222_v48 = vadd.f32 %v221_v46, %v220_v44  ;;  %v235_v49 = vrot.slane %v234_v47, 1 }
  0xfe   :  { %223 = vst [vmem:[%s408_s4] sm:$0x1] %v222_v48  ;;  %v236_v50 = vadd.f32 %v235_v49, %v234_v47 }
 0x100   :  { %237 = vst [vmem:[%s409_s5] sm:$0x1] %v236_v50 }

// kernel: forward.5
= control target key start
LH: loop header
LB: loop body
LE: loop exit
PB: predicated region body
PF: predicated region fallthrough
CT: control target
= control target key end

     0   :  { %s3161_s0 = inlined_call_operand.vmem [shape: bf16[2,16,128], index: 0, kind: input, shape index: {}]   ;;  %s3162_s1 = inlined_call_operand.vmem [shape: bf16[2,16,128], index: 1, kind: input, shape index: {}]   ;;  %s3163_s2 = inlined_call_operand.vmem [shape: f32[1,128], index: 2, kind: input, shape index: {}]   ;;  %s3164_s3 = inlined_call_operand.vmem [shape: f32[1,128], index: 3, kind: input, shape index: {}]   ;;  %s3165_s4 = inlined_call_operand.vmem [shape: f32[1,128], index: 4, kind: input, shape index: {}]   ;;  %s3166_s5 = inlined_call_operand.vmem [shape: f32[1,128], index: 5, kind: input, shape index: {}]   ;;  %s3167_s6 = inlined_call_operand.vmem [shape: bf16[128,128], index: 6, kind: input, shape index: {}]   ;;  %s3168_s7 = inlined_call_operand.vmem [shape: f32[1,128], index: 7, kind: input, shape index: {}]   ;;  %s3169_s8 = inlined_call_operand.vmem [shape: bf16[128,384], index: 8, kind: input, shape index: {}]   ;;  %s3170_s9 = inlined_call_operand.vmem [shape: f32[1,384], index: 9, kind: input, shape index: {}]   ;;  %s3171_s10 = inlined_call_operand.vmem [shape: bf16[128,128], index: 10, kind: input, shape index: {}]   ;;  %s3172_s11 = inlined_call_operand.vmem [shape: f32[1,128], index: 11, kind: input, shape index: {}]   ;;  %s3173_s12 = inlined_call_operand.vmem [shape: bf16[128,128], index: 12, kind: input, shape index: {}]   ;;  %s3174_s13 = inlined_call_operand.vmem [shape: bf16[128,128], index: 13, kind: input, shape index: {}]   ;;  %s3175_s14 = inlined_call_operand.vmem [shape: f32[1,128], index: 14, kind: input, shape index: {}]   ;;  %s3176_s15 = inlined_call_operand.vmem [shape: bf16[128,128], index: 15, kind: input, shape index: {}]   ;;  %s3177_s16 = inlined_call_operand.vmem [shape: f32[1,128], index: 16, kind: input, shape index: {}]   ;;  %s3178_s17 = inlined_call_operand.hbm [shape: f32[2,16,128], index: 17, kind: output, shape index: {}]  }
   0x1   :  { %3188 = sst [smem:[#allocation12_spill]] %s3161_s0 }
   0x2   :  { %3189 = sst [smem:[#allocation13_spill]] %s3162_s1 }
   0x3   :  { %3190 = sst [smem:[#allocation14_spill]] %s3178_s17 }
   0x4   :  { %22 = vsyncpa [#allocation3], 0 }
   0x5   :  { %24 = vsyncpa [#allocation3 + $0x1], 0  ;;  %s2672_s24 = smov 0   ;;  %s2674_s25 = smov 0  }
   0x6   :  { %s2676_s26 = smov 0   ;;  %s2678_s27 = smov 0  }
   0x7 LB: > { %3191 = sst [smem:[#allocation5_spill]] %s2562_s24  ;;  %s2693_s28 = sadd.s32 4294967295, %s2574_s27   ;;  %s2574_s27 = sphi %s2678_s27, %s3207_s27   ;;  %s2570_s26 = sphi %s2676_s26, %s3209_s26   ;;  %s2566_s25 = sphi %s2674_s25, %s3211_s25   ;;  %s2562_s24 = sphi %s2672_s24, %s3210_s24  }
   0x8   : > { %3192 = sst [smem:[#allocation6_spill]] %s2570_s26  ;;  %s2024_s29 = sadd.s32 4294967294, %s2574_s27  }
   0x9   : > { %3193 = sst [smem:[#allocation7_spill]] %s2574_s27  ;;  %s2697_s0 = sadd.s32 1, %s2574_s27  }
   0xa   : > { %3194 = sst [smem:[#allocation8_spill]] %s2697_s0  ;;  %s404_s30 = sadd.s32 1, %s2570_s26 }
   0xb   : > { %s401_s18 = ssub.s32 %s2574_s27, %s2697_s0  ;;  %p414_p0 = scmp.ne.s32.totalorder %s2570_s26, %s2566_s25 }
   0xc   : > { %p402_p1 = scmp.eq.s32.totalorder %s401_s18, 0  ;;  %p415_p2 = scmp.eq.s32.totalorder %s2693_s28, 1 }
   0xd   : > { %p420_p3 = scmp.ne.s32.totalorder %s2566_s25, %s2562_s24  ;;  %p421_p4 = scmp.eq.s32.totalorder %s2024_s29, 1 }
   0xe   : > { %s2708_s19 = scalar_select %p402_p1, %s2570_s26, %s404_s30  }
   0xf   : > { %p2710_p5 = por %p415_p2, %p414_p0  ;;  %p2714_p6 = por %p421_p4, %p420_p3 }
  0x10   : > { %3195 = sst [smem:[#allocation9_spill]] %s2708_s19  ;;  %p2027_p7 = scmp.ge.s32.totalorder %s2574_s27, 1 }
  0x11   : > { %s3196_s1 = scalar_select %p2710_p5, 1, 0 }
  0x12   : > { %s3198_s20 = scalar_select %p2714_p6, 1, 0 }
  0x13   : > { %3197 = sst [smem:[#allocation10_spill]] %s3196_s1  ;;  %p500_p8 = scmp.lt.s32.totalorder %s2574_s27, 3 }
  0x14   : > { %3199 = sst [smem:[#allocation11_spill]] %s3198_s20 }
  0x15   : > { %p501_p9 = pnand %p2027_p7, %p500_p8 }
  0x16   : > { %p557_p10 = scmp.lt.s32.totalorder (!%p501_p9), %s2693_s28, 1  ;;  %s3200_s19 = sld [smem:[#allocation12_spill]] (!%p501_p9) }
  0x17   : > { %504 = sbr.rel (%p501_p9) target bundleno = 2086 (0x826), region = 88  ;;  %s3201_s18 = sld [smem:[#allocation13_spill]] (!%p501_p9) }
  0x18   : > { %s554_s24 = sand.u32 (!%p501_p9), 1, %s2566_s25  }
  0x19   : > { %s3121_s0 = scalar_lea.sflag (!%p501_p9), [#allocation3], %s554_s24 }
  0x1c   : > { %v2406_v0 = vld [vmem:[%s3167_s6 + $0x38] sm:$0xff]   ;;  %v2576_v1 = vmov 0.0   ;;  %v2407_v2 = vld [vmem:[%s3167_s6 + $0x30] sm:$0xff]   ;;  %vm2577_vm0 = vmmov 0   ;;  %s2732_s30 = scalar_select %p557_p10, %s2693_s28, 1  ;;  %v2408_v3 = vld [vmem:[%s3167_s6 + $0x28] sm:$0xff]   ;;  %v744_v56 = vlaneseq }
  0x1d   : > { %2194 = vmatprep.subr.bf16.mxu0 %v2576_v1  ;;  %2210 = vmatprep.mubr.msk.bf16.mxu0 %vm2577_vm0, %v2576_v1  ;;  %v2409_v4 = vld [vmem:[%s3167_s6 + $0x20] sm:$0xff]   ;;  %v2414_v6 = vld [vmem:[%s3169_s8 + $0xac] ss:$12 sps:$4 sm:$0xff]   ;;  %v2416_v7 = vld [vmem:[%s3169_s8 + $0xa8] ss:$12 sps:$4 sm:$0xff]   ;;  %v2578_v45 = vmov 0  }
  0x1e   : > { %2195 = vmatpush3.bf16.msra.mxu0 %v2406_v0  ;;  %s2113_s22 = sshll.u32 %s2732_s30, 3  ;;  %v2033_v8 = vld [vmem:[%s3163_s2] ss:$0 sm:$0xff]  ;;  %887 = vmatprep.subr.bf16.mxu1 %v2414_v6  ;;  %v2420_v12 = vld [vmem:[%s3169_s8 + $0x90] ss:$12 sps:$4 sm:$0xff]   ;;  %v2412_v21 = vld [vmem:[%s3167_s6 + $0x8] sm:$0xff]  }
  0x1f   : > { %2196 = vmatprep.subr.bf16.mxu0 %v2576_v1  ;;  %s561_s26 = scalar_lea.vmem %s3200_s19, %s2113_s22  ;;  %v2418_v10 = vld [vmem:[%s3169_s8 + $0x94] ss:$12 sps:$4 sm:$0xff]   ;;  %888 = vmatpush1.bf16.msra.mxu1 %v2416_v7  ;;  %v2410_v13 = vld [vmem:[%s3167_s6 + $0x18] sm:$0xff]   ;;  %v2426_v20 = vld [vmem:[%s3169_s8 + $0x64] ss:$12 sps:$4 sm:$0xff]   ;;  %v2873_v57 = vshrl.u32 %v744_v56, 7  ;;  %s566_s21 = scalar_lea.vmem %s3201_s18, %s2113_s22 }
  0x20   : > { %v2117_v5 = vld [vmem:[%s561_s26] sm:$0xff]   ;;  %889 = vmatprep.subr.bf16.mxu1 %v2418_v10  ;;  %v2422_v14 = vld [vmem:[%s3169_s8 + $0x7c] ss:$12 sps:$4 sm:$0xff]   ;;  %v2411_v15 = vld [vmem:[%s3167_s6 + $0x10] sm:$0xff]   ;;  %919 = vmatprep.mubr.bf16.mxu1 %v2578_v45  ;;  %v975_v58 = vand.u32 127, %v744_v56  ;;  %vm1024_vm11 = vcmask 130048  }
  0x21   : > { %v2118_v9 = vunpack.c.l.bf16 %v2117_v5  ;;  %v2119_v11 = vunpack.c.h.bf16 %v2117_v5  ;;  %v2034_v17 = vld [vmem:[%s3164_s3] ss:$0 sm:$0xff]  ;;  %v2424_v19 = vld [vmem:[%s3169_s8 + $0x78] ss:$12 sps:$4 sm:$0xff]   ;;  %v2432_v26 = vld [vmem:[%s3169_s8 + $0x48] ss:$12 sps:$4 sm:$0xff]  }
  0x22   : > { %2197 = vmatpush3.bf16.msra.mxu0 %v2407_v2  ;;  %v2428_v24 = vld [vmem:[%s3169_s8 + $0x60] ss:$12 sps:$4 sm:$0xff]   ;;  %v2417_v31 = vld [vmem:[%s3169_s8 + $0xb0] ss:$12 sps:$4 sm:$0xff]   ;;  %v2421_v33 = vld [vmem:[%s3169_s8 + $0x98] ss:$12 sps:$4 sm:$0xff]  }
  0x23   : > { %2198 = vmatprep.subr.bf16.mxu0 %v2576_v1  ;;  %v579_v16 = vmul.f32 %v2118_v9, %v2033_v8  ;;  %v580_v18 = vmul.f32 %v2119_v11, %v2033_v8  ;;  %890 = vmatpush1.bf16.msra.mxu1 %v2420_v12  ;;  %v2430_v25 = vld [vmem:[%s3169_s8 + $0x4c] ss:$12 sps:$4 sm:$0xff]   ;;  %v2413_v27 = vld [vmem:[%s3167_s6] sm:$0xff]   ;;  %v2429_v35 = vld [vmem:[%s3169_s8 + $0x68] ss:$12 sps:$4 sm:$0xff]   ;;  %v754_v59 = vsub.s32 2, %v2873_v57 }
  0x24   : > { %891 = vmatprep.subr.bf16.mxu1 %v2422_v14  ;;  %v2434_v29 = vld [vmem:[%s3169_s8 + $0x34] ss:$12 sps:$4 sm:$0xff]   ;;  %v2433_v36 = vld [vmem:[%s3169_s8 + $0x50] ss:$12 sps:$4 sm:$0xff]   ;;  %v2437_v38 = vld [vmem:[%s3169_s8 + $0x38] ss:$12 sps:$4 sm:$0xff]  }
  0x25   : > { %v2786_v22 = vadd.f32 %v2034_v17, %v579_v16  ;;  %v2788_v23 = vadd.f32 %v2034_v17, %v580_v18  ;;  %v2425_v34 = vld [vmem:[%s3169_s8 + $0x80] ss:$12 sps:$4 sm:$0xff]   ;;  %v2436_v37 = vld [vmem:[%s3169_s8 + $0x30] ss:$12 sps:$4 sm:$0xff]   ;;  %v2440_v40 = vld [vmem:[%s3169_s8 + $0x18] ss:$12 sps:$4 sm:$0xff]  }
  0x26   : > { %2199 = vmatpush3.bf16.msra.mxu0 %v2408_v3  ;;  %v2438_v39 = vld [vmem:[%s3169_s8 + $0x1c] ss:$12 sps:$4 sm:$0xff]   ;;  %v2441_v41 = vld [vmem:[%s3169_s8 + $0x20] ss:$12 sps:$4 sm:$0xff]   ;;  %v2442_v42 = vld [vmem:[%s3169_s8 + $0x4] ss:$12 sps:$4 sm:$0xff]  }
  0x27   : > { %2200 = vmatprep.subr.bf16.mxu0 %v2576_v1  ;;  %892 = vmatpush1.bf16.msra.mxu1 %v2424_v19  ;;  %v590_v28 = vmax.f32 %v2786_v22, 0.0  ;;  %v591_v30 = vmax.f32 %v2788_v23, 0.0  ;;  %v2444_v43 = vld [vmem:[%s3169_s8] ss:$12 sps:$4 sm:$0xff]   ;;  %v2445_v44 = vld [vmem:[%s3169_s8 + $0x8] ss:$12 sps:$4 sm:$0xff]  }
  0x28   : > { %893 = vmatprep.subr.bf16.mxu1 %v2426_v20  ;;  %v2043_v49 = vld [vmem:[%s3168_s7] ss:$0 sm:$0xff]  ;;  %vm1213_vm1 = vcmp.ge.s32.totalorder %v975_v58, 16  ;;  %vm1214_vm2 = vcmp.lt.s32.totalorder %v975_v58, 24  ;;  %vm1333_vm3 = vcmp.ge.s32.totalorder %v975_v58, 24  ;;  %vm1334_vm4 = vcmp.lt.s32.totalorder %v975_v58, 32 }
  0x29   : > { %v592_v32 = vpack.c.bf16 %v591_v30, %v590_v28  ;;  %v742_v60 = vld [vmem:[%s3170_s9] sm:$0x7]  ;;  %vm977_vm5 = vcmp.lt.s32.totalorder %v975_v58, 8  ;;  %vm1215_vm6 = vmand %vm1213_vm1, %vm1214_vm2  ;;  %v746_v62 = vsub.s32 0, %v2873_v57  ;;  %v750_v63 = vsub.s32 1, %v2873_v57  ;;  %s2028_s26 = sshll.u32 %s554_s24, 4 }
  0x2a   : > { %2201 = vmatpush3.bf16.msra.mxu0 %v2409_v4  ;;  %v755_v61 = vrot.slane %v742_v60, %v754_v59  ;;  %vm1335_vm7 = vmand %vm1333_vm3, %vm1334_vm4  ;;  %v979_v2 = vsel %vm977_vm5, 1.0, %v2576_v1  ;;  %v1216_v3 = vsel %vm1215_vm6, 1.0, %v2576_v1  ;;  %vm1051_vm8 = vcmp.ge.s32.totalorder %v975_v58, 8  ;;  %s2115_s22 = sshll.u32 %s2693_s28, 8  ;;  %s556_s17 = scalar_lea.vmem [#allocation2], %s2028_s26 }
  0x2b   : > { %2202 = vmatprep.subr.bf16.mxu0 %v2576_v1  ;;  %894 = vmatpush1.bf16.msra.mxu1 %v2428_v24  ;;  %v1336_v5 = vsel %vm1335_vm7, 1.0, %v2576_v1  ;;  %v747_v7 = vrot.slane %v742_v60, %v746_v62  ;;  %v751_v12 = vrot.slane %v742_v60, %v750_v63  ;;  %vm1052_vm9 = vcmp.lt.s32.totalorder %v975_v58, 16  ;;  %s1950_s1 = sshll.u32 %s556_s17, 4  ;;  %s3203_s18 = sld [smem:[#allocation14_spill]]  ;;  %s3119_s1 = int_to_ptr.vmem [resolvable:$true] %s1950_s1 }
  0x2c   : > { %895 = vmatprep.subr.bf16.mxu1 %v2430_v25  ;;  %vm1053_vm10 = vmand %vm1051_vm8, %vm1052_vm9  ;;  %s2514_s28 = scalar_lea.vmem %s3119_s1, 256  ;;  %s2579_s19 = smov [#allocation2]  }
  0x2d   : > { %p2515_p11 = scmp.ne.s32.totalorder %s3119_s1, %s2514_s28  ;;  %s2518_s26 = sshll.u32 %s2579_s19, 4  ;;  %s2519_s26 = int_to_ptr.vmem [resolvable:$false] %s2518_s26 }
  0x2e   : > { %2203 = vmatpush3.bf16.msra.mxu0 %v2410_v13  ;;  %s2520_s27 = scalar_lea.vmem %s2519_s26, 512  ;;  %p2521_p0 = scmp.lt.s32.totalorder %s3119_s1, %s2519_s26 }
  0x2f   : > { %2204 = vmatprep.subr.bf16.mxu0 %v2576_v1  ;;  %896 = vmatpush1.bf16.msra.mxu1 %v2432_v26  ;;  %p2516_p12 = pnand %p2515_p11, %p2710_p5  ;;  %p2522_p1 = scmp.lt.s32.totalorder %s2520_s27, %s2514_s28 }
  0x30   : > { %897 = vmatprep.subr.bf16.mxu1 %v2434_v29 }
  0x31   : > { %p2517_p13 = pneg %p2516_p12  ;;  %p2523_p2 = por %p2522_p1, %p2521_p0 }
  0x32   : > { %2205 = vmatpush3.bf16.msra.mxu0 %v2411_v15 }
  0x33   : > { %2206 = vmatprep.subr.bf16.mxu0 %v2576_v1  ;;  %898 = vmatpush1.bf16.msra.mxu1 %v2436_v37  ;;  %p2524_p3 = pnand %p2523_p2, %p2517_p13 }
  0x34   : > { %899 = vmatprep.subr.bf16.mxu1 %v2438_v39 }
  0x36   : > { %2207 = vmatpush3.bf16.msra.mxu0 %v2412_v21 }
  0x37   : > { %2208 = vmatprep.subr.bf16.mxu0 %v2576_v1  ;;  %900 = vmatpush1.bf16.msra.mxu1 %v2440_v40 }
  0x38   : > { %901 = vmatprep.subr.bf16.mxu1 %v2442_v42 }
  0x3a   : > { %2209 = vmatpush3.bf16.msra.mxu0 %v2413_v27 }
  0x3b   : > { %2214 = vmatprep.subr.bf16.mxu0 %v2576_v1  ;;  %902 = vmatpush1.bf16.msra.mxu1 %v2444_v43 }
  0x3c   : > { %2234 = vmatprep.subr.bf16.mxu1 %v2576_v1 }
  0x3d   : > { %2211 = vmatmul.mubr.bf16.vlgmr.msra.gmra.mxu0 %v592_v32 }
  0x3e   : > { %2215 = vmatpush3.bf16.msra.mxu0 %v2417_v31  ;;  %2230 = vmatprep.mubr.msk.bf16.mxu0 %vm2577_vm0, %v2576_v1 }
  0x3f   : > { %2216 = vmatprep.subr.bf16.mxu0 %v2576_v1 }
  0x42   : > { %2217 = vmatpush3.bf16.msra.mxu0 %v2421_v33 }
  0x43   : > { %2218 = vmatprep.subr.bf16.mxu0 %v2576_v1 }
  0x46   : > { %2219 = vmatpush3.bf16.msra.mxu0 %v2425_v34 }
  0x47   : > { %2220 = vmatprep.subr.bf16.mxu0 %v2576_v1 }
  0x4a   : > { %2221 = vmatpush3.bf16.msra.mxu0 %v2429_v35 }
  0x4b   : > { %2222 = vmatprep.subr.bf16.mxu0 %v2576_v1 }
  0x4e   : > { %2223 = vmatpush3.bf16.msra.mxu0 %v2433_v36 }
  0x4f   : > { %2224 = vmatprep.subr.bf16.mxu0 %v2576_v1 }
  0x52   : > { %2225 = vmatpush3.bf16.msra.mxu0 %v2437_v38  ;;  %v1054_v38 = vsel %vm1053_vm10, 1.0, %v2576_v1 }
  0x53   : > { %2226 = vmatprep.subr.bf16.mxu0 %v2576_v1 }
  0x56   : > { %2227 = vmatpush3.bf16.msra.mxu0 %v2441_v41 }
  0x57   : > { %2228 = vmatprep.subr.bf16.mxu0 %v2576_v1 }
  0x5a   : > { %2229 = vmatpush3.bf16.msra.mxu0 %v2445_v44 }
  0x5b   : > { %2258 = vmatprep.subr.bf16.mxu0 %v2576_v1 }
  0xfd   : > { %v691_v46 = vpop.f32.mrf.mxu0 }
  0xfe   : > { %v698_v48 = vadd.f32 %v691_v46, %v590_v28 }
  0xff   : > { %v2212_v47 = vpop.f32.mrf.mxu0 }
 0x100   : > { %v2863_v53 = vadd.f32 %v2043_v49, %v698_v48 }
 0x101   : > { %v694_v50 = vpop.f32.mrf.mxu0 }
 0x102   : > { %v699_v51 = vadd.f32 %v694_v50, %v591_v30 }
 0x103   : > { %v2213_v52 = vpop.f32.mrf.mxu0 }
 0x104   : > { %v2865_v54 = vadd.f32 %v2043_v49, %v699_v51 }
 0x106   : > { %v709_v55 = vpack.c.bf16 %v2865_v54, %v2863_v53 }
 0x108   : > { %920 = vmatmul.mubr.bf16.vlgmr.msra.gmra.mxu1 %v709_v55  ;;  %2231 = vmatmul.mubr.bf16.vlgmr.msra.gmra.mxu0 %v709_v55 }
 0x109   : > { %2236 = vmatprep.mubr.msk.bf16.mxu1 %vm2577_vm0, %v2576_v1  ;;  %2260 = vmatprep.mubr.msk.bf16.mxu0 %vm2577_vm0, %v2576_v1 }
 0x1c8   : > { %v921_v0 = vpop.f32.mrf.mxu1  ;;  %v964_v4 = vpop.f32.mrf.mxu0 }
 0x1c9   : > { %v965_v6 = vadd.f32 %v964_v4, %v755_v61  ;;  %v922_v16 = vadd.f32 %v921_v0, %v747_v7 }
 0x1ca   : > { %v923_v8 = vpop.f32.mrf.mxu1  ;;  %v2232_v9 = vpop.f32.mrf.mxu0 }
 0x1cb   : > { %v2886_v10 = vmul.f32 %v979_v2, %v965_v6  ;;  %v2888_v11 = vmul.f32 %v1216_v3, %v965_v6  ;;  %v2890_v13 = vmul.f32 %v1336_v5, %v965_v6  ;;  %v924_v21 = vadd.f32 %v923_v8, %v751_v12 }
 0x1cc   : > { %v925_v14 = vpop.f32.mrf.mxu1  ;;  %v967_v15 = vpop.f32.mrf.mxu0  ;;  %v971_v28 = vmul.f32 0.35355338, %v922_v16  ;;  %v1121_v44 = vmul.f32 %v1054_v38, %v965_v6 }
 0x1cd   : > { %v926_v17 = vadd.f32 %v925_v14, %v747_v7  ;;  %v968_v18 = vadd.f32 %v967_v15, %v755_v61 }
 0x1ce   : > { %v927_v19 = vpop.f32.mrf.mxu1  ;;  %v2233_v20 = vpop.f32.mrf.mxu0  ;;  %v980_v34 = vmul.f32 %v979_v2, %v971_v28  ;;  %v1217_v35 = vmul.f32 %v1216_v3, %v971_v28  ;;  %v1055_v42 = vmul.f32 %v1054_v38, %v971_v28  ;;  %v1337_v43 = vmul.f32 %v1336_v5, %v971_v28 }
 0x1cf   : > { %v928_v22 = vadd.f32 %v927_v19, %v751_v12  ;;  %v972_v23 = vmul.f32 0.35355338, %v926_v17  ;;  %v2892_v24 = vmul.f32 %v979_v2, %v968_v18  ;;  %v2894_v25 = vmul.f32 %v1216_v3, %v968_v18 }
 0x1d0   : > { %v2896_v26 = vmul.f32 %v1336_v5, %v968_v18  ;;  %v1122_v41 = vmul.f32 %v1054_v38, %v968_v18 }
 0x1d1   : > { %v973_v27 = vpack.c.bf16 %v928_v22, %v924_v21  ;;  %v1049_v29 = vpack.c.bf16 %v2892_v24, %v2886_v10  ;;  %v1285_v30 = vpack.c.bf16 %v2894_v25, %v2888_v11  ;;  %v981_v31 = vmul.f32 %v979_v2, %v972_v23 }
 0x1d2   : > { %v1218_v32 = vmul.f32 %v1216_v3, %v972_v23  ;;  %v1405_v33 = vpack.c.bf16 %v2896_v26, %v2890_v13  ;;  %v1056_v39 = vmul.f32 %v1054_v38, %v972_v23  ;;  %v1338_v40 = vmul.f32 %v1336_v5, %v972_v23  ;;  %v2447_v13 = vld [vmem:[%s3171_s10 + $0x30] sm:$0xff]   ;;  %v2448_v26 = vld [vmem:[%s3171_s10 + $0x28] sm:$0xff]  }
 0x1d3   : > { %2235 = vmatpush3.bf16.xpose.msra.mxu1 %v973_v27  ;;  %2259 = vmatpush3.bf16.xpose.msra.mxu0 %v973_v27  ;;  %v982_v36 = vpack.c.bf16 %v981_v31, %v980_v34  ;;  %v1123_v47 = vpack.c.bf16 %v1122_v41, %v1121_v44 }
 0x1d4   : > { %2240 = vmatprep.subr.bf16.mxu1 %v2576_v1  ;;  %2270 = vmatprep.subr.bf16.mxu0 %v2576_v1  ;;  %v1219_v37 = vpack.c.bf16 %v1218_v32, %v1217_v35  ;;  %v1057_v45 = vpack.c.bf16 %v1056_v39, %v1055_v42  ;;  %v1339_v46 = vpack.c.bf16 %v1338_v40, %v1337_v43 }
 0x1da   : > { %2237 = vmatmul.mubr.bf16.vlgmr.msra.gmra.mxu1 %v982_v36  ;;  %2261 = vmatmul.mubr.bf16.vlgmr.msra.gmra.mxu0 %v1219_v37 }
 0x1db   : > { %2241 = vmatpush3.bf16.xpose.msra.mxu1 %v973_v27  ;;  %2271 = vmatpush3.bf16.xpose.msra.mxu0 %v973_v27 }
 0x1dc   : > { %2242 = vmatprep.mubr.msk.bf16.mxu1 %vm2577_vm0, %v2576_v1  ;;  %2272 = vmatprep.mubr.msk.bf16.mxu0 %vm2577_vm0, %v2576_v1 }
 0x1dd   : > { %2246 = vmatprep.subr.bf16.mxu1 %v2576_v1  ;;  %2282 = vmatprep.subr.bf16.mxu0 %v2576_v1 }
 0x1e2   : > { %2243 = vmatmul.mubr.bf16.vlgmr.msra.gmra.mxu1 %v1057_v45  ;;  %2273 = vmatmul.mubr.bf16.vlgmr.msra.gmra.mxu0 %v1339_v46 }
 0x1e3   : > { %2247 = vmatpush3.bf16.msra.mxu1 %v1123_v47  ;;  %2248 = vmatprep.mubr.msk.bf16.mxu1 %vm2577_vm0, %v2576_v1 }
 0x1e4   : > { %2252 = vmatprep.subr.bf16.mxu1 %v2576_v1  ;;  %2298 = vmatprep.mubr.msk.bf16.mxu0 %vm2577_vm0, %v2576_v1 }
 0x29a   : > { %v1017_v48 = vpop.f32.mrf.mxu1  ;;  %v1254_v49 = vpop.f32.mrf.mxu0 }
 0x29b   : > { %v1025_v50 = vsel %vm1024_vm11, %v1017_v48, -inf  ;;  %v1261_v14 = vsel %vm1024_vm11, %v1254_v49, -inf }
 0x29c   : > { %1026 = vmax.xlane.f32.xlu1 %v1025_v50  ;;  %v2238_v51 = vpop.f32.mrf.mxu1  ;;  %v2262_v52 = vpop.f32.mrf.mxu0 }
 0x29e   : > { %v1020_v55 = vpop.f32.mrf.mxu1  ;;  %v1257_v56 = vpop.f32.mrf.mxu0 }
 0x29f   : > { %v1028_v58 = vsel %vm1024_vm11, %v1020_v55, -inf  ;;  %v1264_v2 = vsel %vm1024_vm11, %v1257_v56, -inf }
 0x2a0   : > { %1029 = vmax.xlane.f32.xlu1 %v1028_v58  ;;  %v2239_v59 = vpop.f32.mrf.mxu1  ;;  %v2263_v60 = vpop.f32.mrf.mxu0 }
 0x2a2   : > { %v1092_v61 = vpop.f32.mrf.mxu1  ;;  %v1374_v63 = vpop.f32.mrf.mxu0 }
 0x2a3   : > { %v1099_v0 = vsel %vm1024_vm11, %v1092_v61, -inf  ;;  %v1381_v15 = vsel %vm1024_vm11, %v1374_v63, -inf }
 0x2a4   : > { %1100 = vmax.xlane.f32.xlu0 %v1099_v0  ;;  %v2244_v3 = vpop.f32.mrf.mxu1  ;;  %1265 = vmax.xlane.f32.xlu1 %v1264_v2  ;;  %v2274_v4 = vpop.f32.mrf.mxu0 }
 0x2a6   : > { %v1095_v5 = vpop.f32.mrf.mxu1  ;;  %v1377_v6 = vpop.f32.mrf.mxu0 }
 0x2a7   : > { %v1102_v7 = vsel %vm1024_vm11, %v1095_v5, -inf  ;;  %v1384_v8 = vsel %vm1024_vm11, %v1377_v6, -inf }
 0x2a8   : > { %1103 = vmax.xlane.f32.xlu0 %v1102_v7  ;;  %v2245_v9 = vpop.f32.mrf.mxu1  ;;  %1385 = vmax.xlane.f32.xlu1 %v1384_v8  ;;  %v2275_v12 = vpop.f32.mrf.mxu0 }
 0x2ac   : > { %1262 = vmax.xlane.f32.xlu0 %v1261_v14 }
 0x2b0   : > { %1382 = vmax.xlane.f32.xlu0 %v1381_v15 }
 0x325   : > { %v1027_v16 = vpop.xlane.xlu1 %1026 }
 0x326   : > { %v1031_v18 = vsub.f32 %v1017_v48, %v1027_v16 }
 0x328   : > { %v1033_v22 = vmul.f32 1.442695, %v1031_v18 }
 0x329   : > { %v1030_v17 = vpop.xlane.xlu1 %1029 }
 0x32a   : > { %v1032_v23 = vsub.f32 %v1020_v55, %v1030_v17 }
 0x32c   : > { %v1035_v32 = vmul.f32 1.442695, %v1032_v23 }
 0x32d   : > { %v1101_v19 = vpop.xlane.xlu0 %1100  ;;  %v1266_v21 = vpop.xlane.xlu1 %1265 }
 0x32e   : > { %v1105_v20 = vsub.f32 %v1092_v61, %v1101_v19  ;;  %v1268_v34 = vsub.f32 %v1257_v56, %v1266_v21 }
 0x330   : > { %v1107_v27 = vmul.f32 1.442695, %v1105_v20  ;;  %v1271_v39 = vmul.f32 1.442695, %v1268_v34  ;;  %v2446_v34 = vld [vmem:[%s3171_s10 + $0x38] sm:$0xff]  }
 0x331   : > { %v1104_v28 = vpop.xlane.xlu0 %1103  ;;  %v1386_v36 = vpop.xlane.xlu1 %1385  ;;  %2283 = vmatpush3.bf16.msra.mxu0 %v2446_v34  ;;  %v2474_v34 = vld [vmem:[%s3176_s15 + $0x18] sm:$0xff]  }
 0x332   : > { %2478 = vpow2.f32 %v1107_v27  ;;  %v1106_v31 = vsub.f32 %v1095_v5, %v1104_v28  ;;  %v1388_v40 = vsub.f32 %v1377_v6, %v1386_v36  ;;  %2284 = vmatprep.subr.bf16.mxu0 %v2576_v1  ;;  %v2451_v36 = vld [vmem:[%s3171_s10 + $0x10] sm:$0xff]  }
 0x333   : > { %2480 = vpow2.f32 %v1033_v22 }
 0x334   : > { %v1109_v35 = vmul.f32 1.442695, %v1106_v31  ;;  %v1391_v44 = vmul.f32 1.442695, %v1388_v40  ;;  %v2455_v40 = vld [vmem:[%s3173_s12 + $0x30] sm:$0xff]  }
 0x335   : > { %v1263_v37 = vpop.xlane.xlu0 %1262  ;;  %2285 = vmatpush3.bf16.msra.mxu0 %v2447_v13  ;;  %v2475_v13 = vld [vmem:[%s3176_s15 + $0x10] sm:$0xff]  }
 0x336   : > { %2482 = vpow2.f32 %v1109_v35  ;;  %v1267_v38 = vsub.f32 %v1254_v49, %v1263_v37  ;;  %2286 = vmatprep.subr.bf16.mxu0 %v2576_v1  ;;  %v2450_v35 = vld [vmem:[%s3171_s10 + $0x18] sm:$0xff]   ;;  %v2452_v37 = vld [vmem:[%s3171_s10 + $0x8] sm:$0xff]  }
 0x337   : > { %2484 = vpow2.f32 %v1035_v32 }
 0x338   : > { %v1269_v41 = vmul.f32 1.442695, %v1267_v38  ;;  %v2453_v38 = vld [vmem:[%s3171_s10] sm:$0xff]  }
 0x339   : > { %v1383_v42 = vpop.xlane.xlu0 %1382  ;;  %2287 = vmatpush3.bf16.msra.mxu0 %v2448_v26 }
 0x33a   : > { %2486 = vpow2.f32 %v1269_v41  ;;  %v1387_v43 = vsub.f32 %v1374_v63, %v1383_v42  ;;  %2288 = vmatprep.subr.bf16.mxu0 %v2576_v1  ;;  %v2456_v41 = vld [vmem:[%s3173_s12 + $0x28] sm:$0xff]   ;;  %v2457_v42 = vld [vmem:[%s3173_s12 + $0x20] sm:$0xff]  }
 0x33b   : > { %2488 = vpow2.f32 %v1271_v39  ;;  %v2454_v39 = vld [vmem:[%s3173_s12 + $0x38] sm:$0xff]  }
 0x33c   : > { %v1389_v45 = vmul.f32 1.442695, %v1387_v43  ;;  %v2458_v43 = vld [vmem:[%s3173_s12 + $0x18] sm:$0xff]  }
 0x33e   : > { %2490 = vpow2.f32 %v1389_v45 }
 0x33f   : > { %v2479_v46 = vpop.eup %2478  ;;  %2492 = vpow2.f32 %v1391_v44 }
 0x340   : > { %v1111_v47 = vsel %vm1024_vm11, %v2479_v46, 0.0  ;;  %v2481_v48 = vpop.eup %2480 }
 0x341   : > { %1112 = vadd.xlane.f32.xlu0 %v1111_v47  ;;  %v1037_v49 = vsel %vm1024_vm11, %v2481_v48, 0.0 }
 0x343   : > { %v2483_v50 = vpop.eup %2482 }
 0x344   : > { %v1114_v51 = vsel %vm1024_vm11, %v2483_v50, 0.0  ;;  %v2485_v52 = vpop.eup %2484 }
 0x345   : > { %1038 = vadd.xlane.f32.xlu0 %v1037_v49  ;;  %1115 = vadd.xlane.f32.xlu1 %v1114_v51  ;;  %v1040_v58 = vsel %vm1024_vm11, %v2485_v52, 0.0 }
 0x347   : > { %v2487_v55 = vpop.eup %2486 }
 0x348   : > { %v1273_v56 = vsel %vm1024_vm11, %v2487_v55, 0.0  ;;  %v2489_v59 = vpop.eup %2488 }
 0x349   : > { %1274 = vadd.xlane.f32.xlu0 %v1273_v56  ;;  %1041 = vadd.xlane.f32.xlu1 %v1040_v58  ;;  %v1276_v63 = vsel %vm1024_vm11, %v2489_v59, 0.0 }
 0x34b   : > { %v2491_v60 = vpop.eup %2490 }
 0x34c   : > { %v1393_v61 = vsel %vm1024_vm11, %v2491_v60, 0.0  ;;  %v2493_v0 = vpop.eup %2492 }
 0x34d   : > { %1394 = vadd.xlane.f32.xlu0 %v1393_v61  ;;  %1277 = vadd.xlane.f32.xlu1 %v1276_v63  ;;  %v1396_v2 = vsel %vm1024_vm11, %v2493_v0, 0.0 }
 0x351   : > { %1397 = vadd.xlane.f32.xlu1 %v1396_v2 }
 0x3ca   : > { %v1113_v3 = vpop.xlane.xlu0 %1112 }
 0x3cb   : > { %2494 = vrcp.f32 %v1113_v3 }
 0x3ce   : > { %v1116_v4 = vpop.xlane.xlu1 %1115  ;;  %v1039_v6 = vpop.xlane.xlu0 %1038 }
 0x3cf   : > { %2496 = vrcp.f32 %v1116_v4 }
 0x3d2   : > { %v1042_v5 = vpop.xlane.xlu1 %1041  ;;  %v1275_v9 = vpop.xlane.xlu0 %1274 }
 0x3d3   : > { %2498 = vrcp.f32 %v1042_v5 }
 0x3d4   : > { %2500 = vrcp.f32 %v1039_v6 }
 0x3d6   : > { %v1278_v7 = vpop.xlane.xlu1 %1277  ;;  %v1395_v20 = vpop.xlane.xlu0 %1394 }
 0x3d7   : > { %2502 = vrcp.f32 %v1278_v7 }
 0x3d8   : > { %v2495_v8 = vpop.eup %2494  ;;  %2504 = vrcp.f32 %v1275_v9  ;;  %v2460_v9 = vld [vmem:[%s3173_s12 + $0x8] sm:$0xff]  }
 0x3d9   : > { %v1119_v14 = vmul.f32 %v2495_v8, %v2479_v46  ;;  %v2459_v8 = vld [vmem:[%s3173_s12 + $0x10] sm:$0xff]  }
 0x3da   : > { %v1398_v18 = vpop.xlane.xlu1 %1397 }
 0x3db   : > { %2506 = vrcp.f32 %v1398_v18 }
 0x3dc   : > { %v2497_v12 = vpop.eup %2496  ;;  %2508 = vrcp.f32 %v1395_v20 }
 0x3dd   : > { %v1120_v15 = vmul.f32 %v2497_v12, %v2483_v50  ;;  %v2461_v12 = vld [vmem:[%s3173_s12] sm:$0xff]  }
 0x3df   : > { %v1124_v16 = vpack.c.bf16 %v1120_v15, %v1119_v14  ;;  %v2462_v14 = vld [vmem:[%s3174_s13 + $0x38] sm:$0xff]   ;;  %v2463_v15 = vld [vmem:[%s3174_s13 + $0x30] sm:$0xff]  }
 0x3e0   : > { %v2499_v17 = vpop.eup %2498 }
 0x3e1   : > { %2249 = vmatmul.mubr.msk.bf16.vlgmr.msra.gmra.mxu1 %vm1024_vm11, %v1124_v16  ;;  %v2501_v19 = vpop.eup %2500  ;;  %v1046_v21 = vmul.f32 %v2499_v17, %v2485_v52  ;;  %v2072_v16 = vld [vmem:[%s3172_s11] ss:$0 sm:$0xff] }
 0x3e2   : > { %2253 = vmatpush3.bf16.msra.mxu1 %v1049_v29  ;;  %2254 = vmatprep.mubr.msk.bf16.mxu1 %vm2577_vm0, %v2576_v1  ;;  %v1045_v22 = vmul.f32 %v2501_v19, %v2481_v48 }
 0x3e3   : > { %2264 = vmatprep.subr.bf16.mxu1 %v2576_v1 }
 0x3e4   : > { %v1050_v23 = vpack.c.bf16 %v1046_v21, %v1045_v22  ;;  %v2503_v27 = vpop.eup %2502 }
 0x3e5   : > { %v2505_v28 = vpop.eup %2504  ;;  %v1282_v10 = vmul.f32 %v2503_v27, %v2489_v59 }
 0x3e6   : > { %v1281_v24 = vmul.f32 %v2505_v28, %v2487_v55 }
 0x3e8   : > { %v1286_v29 = vpack.c.bf16 %v1282_v10, %v1281_v24  ;;  %v2507_v31 = vpop.eup %2506  ;;  %v2464_v10 = vld [vmem:[%s3174_s13 + $0x28] sm:$0xff]   ;;  %v2465_v24 = vld [vmem:[%s3174_s13 + $0x20] sm:$0xff]  }
 0x3e9   : > { %2255 = vmatmul.mubr.msk.bf16.vlgmr.msra.gmra.mxu1 %vm1024_vm11, %v1050_v23  ;;  %v2509_v32 = vpop.eup %2508  ;;  %v1402_v11 = vmul.f32 %v2507_v31, %v2493_v0  ;;  %v2469_v31 = vld [vmem:[%s3174_s13] sm:$0xff]  }
 0x3ea   : > { %2265 = vmatpush3.bf16.msra.mxu1 %v1285_v30  ;;  %2266 = vmatprep.mubr.msk.bf16.mxu1 %vm2577_vm0, %v2576_v1  ;;  %v1401_v25 = vmul.f32 %v2509_v32, %v2491_v60  ;;  %v2470_v32 = vld [vmem:[%s3176_s15 + $0x38] sm:$0xff]  }
 0x3eb   : > { %2276 = vmatprep.subr.bf16.mxu1 %v2576_v1 }
 0x3ec   : > { %v1406_v30 = vpack.c.bf16 %v1402_v11, %v1401_v25  ;;  %v2471_v11 = vld [vmem:[%s3176_s15 + $0x30] sm:$0xff]   ;;  %v2472_v25 = vld [vmem:[%s3176_s15 + $0x28] sm:$0xff]  }
 0x3f1   : > { %2267 = vmatmul.mubr.msk.bf16.vlgmr.msra.gmra.mxu1 %vm1024_vm11, %v1286_v29  ;;  %v2468_v29 = vld [vmem:[%s3174_s13 + $0x8] sm:$0xff]  }
 0x3f2   : > { %2277 = vmatpush3.bf16.msra.mxu1 %v1405_v33  ;;  %2278 = vmatprep.mubr.msk.bf16.mxu1 %vm2577_vm0, %v2576_v1  ;;  %v2449_v33 = vld [vmem:[%s3171_s10 + $0x20] sm:$0xff]  }
 0x3f3   : > { %2302 = vmatprep.subr.bf16.mxu1 %v2576_v1  ;;  %2289 = vmatpush3.bf16.msra.mxu0 %v2449_v33 }
 0x3f4   : > { %2290 = vmatprep.subr.bf16.mxu0 %v2576_v1 }
 0x3f7   : > { %2291 = vmatpush3.bf16.msra.mxu0 %v2450_v35 }
 0x3f8   : > { %2292 = vmatprep.subr.bf16.mxu0 %v2576_v1 }
 0x3f9   : > { %2279 = vmatmul.mubr.msk.bf16.vlgmr.msra.gmra.mxu1 %vm1024_vm11, %v1406_v30  ;;  %v2473_v30 = vld [vmem:[%s3176_s15 + $0x20] sm:$0xff]  }
 0x3fa   : > { %2318 = vmatprep.mubr.msk.bf16.mxu1 %vm2577_vm0, %v2576_v1  ;;  %2303 = vmatpush3.bf16.msra.mxu1 %v2454_v39 }
 0x3fb   : > { %2293 = vmatpush3.bf16.msra.mxu0 %v2451_v36  ;;  %2304 = vmatprep.subr.bf16.mxu1 %v2576_v1 }
 0x3fc   : > { %2294 = vmatprep.subr.bf16.mxu0 %v2576_v1 }
 0x3fe   : > { %2305 = vmatpush3.bf16.msra.mxu1 %v2455_v40 }
 0x3ff   : > { %2295 = vmatpush3.bf16.msra.mxu0 %v2452_v37  ;;  %2306 = vmatprep.subr.bf16.mxu1 %v2576_v1 }
 0x400   : > { %2296 = vmatprep.subr.bf16.mxu0 %v2576_v1 }
 0x402   : > { %2307 = vmatpush3.bf16.msra.mxu1 %v2456_v41 }
 0x403   : > { %2297 = vmatpush3.bf16.msra.mxu0 %v2453_v38  ;;  %2308 = vmatprep.subr.bf16.mxu1 %v2576_v1 }
 0x404   : > { %2322 = vmatprep.subr.bf16.mxu0 %v2576_v1 }
 0x406   : > { %2309 = vmatpush3.bf16.msra.mxu1 %v2457_v42 }
 0x407   : > { %2310 = vmatprep.subr.bf16.mxu1 %v2576_v1 }
 0x40a   : > { %2311 = vmatpush3.bf16.msra.mxu1 %v2458_v43 }
 0x40b   : > { %2312 = vmatprep.subr.bf16.mxu1 %v2576_v1 }
 0x40e   : > { %2313 = vmatpush3.bf16.msra.mxu1 %v2459_v8 }
 0x40f   : > { %2314 = vmatprep.subr.bf16.mxu1 %v2576_v1 }
 0x412   : > { %2315 = vmatpush3.bf16.msra.mxu1 %v2460_v9 }
 0x413   : > { %2316 = vmatprep.subr.bf16.mxu1 %v2576_v1 }
 0x416   : > { %2317 = vmatpush3.bf16.msra.mxu1 %v2461_v12  ;;  %v2106_v12 = vld [vmem:[%s3165_s4] ss:$0 sm:$0xff] }
 0x417   : > { %2342 = vmatprep.subr.bf16.mxu1 %v2576_v1 }
 0x4a1   : > { %v1162_v44 = vpop.f32.mrf.mxu1 }
 0x4a3   : > { %v2250_v45 = vpop.f32.mrf.mxu1 }
 0x4a5   : > { %v1165_v46 = vpop.f32.mrf.mxu1 }
 0x4a7   : > { %v2251_v47 = vpop.f32.mrf.mxu1 }
 0x4a9   : > { %v1206_v48 = vpop.f32.mrf.mxu1 }
 0x4aa   : > { %v1207_v60 = vadd.f32 %v1206_v48, %v1162_v44  ;;  %v2476_v48 = vld [vmem:[%s3176_s15 + $0x8] sm:$0xff]  }
 0x4ab   : > { %v2256_v50 = vpop.f32.mrf.mxu1 }
 0x4ac   : > { %v2477_v50 = vld [vmem:[%s3176_s15] sm:$0xff]  }
 0x4ad   : > { %v1209_v49 = vpop.f32.mrf.mxu1 }
 0x4ae   : > { %v1210_v61 = vadd.f32 %v1209_v49, %v1165_v46  ;;  %v1700_v49 = vld [vmem:[%s3175_s14] sm:$0x1] }
 0x4af   : > { %v2257_v51 = vpop.f32.mrf.mxu1 }
 0x4b1   : > { %v1324_v52 = vpop.f32.mrf.mxu1 }
 0x4b2   : > { %v1331_v0 = vadd.f32 %v1324_v52, %v1207_v60 }
 0x4b3   : > { %v2268_v55 = vpop.f32.mrf.mxu1 }
 0x4b5   : > { %v1327_v56 = vpop.f32.mrf.mxu1 }
 0x4b6   : > { %v1332_v2 = vadd.f32 %v1327_v56, %v1210_v61 }
 0x4b7   : > { %v2269_v58 = vpop.f32.mrf.mxu1 }
 0x4b9   : > { %v1444_v59 = vpop.f32.mrf.mxu1 }
 0x4ba   : > { %v1451_v4 = vadd.f32 %v1444_v59, %v1331_v0 }
 0x4bb   : > { %v2280_v63 = vpop.f32.mrf.mxu1 }
 0x4bd   : > { %v1447_v3 = vpop.f32.mrf.mxu1 }
 0x4be   : > { %v1452_v5 = vadd.f32 %v1447_v3, %v1332_v2 }
 0x4bf   : > { %v2281_v6 = vpop.f32.mrf.mxu1 }
 0x4c0   : > { %v1453_v7 = vpack.c.bf16 %v1452_v5, %v1451_v4 }
 0x4c2   : > { %2299 = vmatmul.mubr.bf16.vlgmr.msra.gmra.mxu0 %v1453_v7  ;;  %v2121_v7 = vld [vmem:[%s566_s21] sm:$0xff]   ;;  %s3117_s21 = scalar_lea.hbm %s3203_s18, %s2115_s22 }
 0x4c3   : > { %2338 = vmatprep.mubr.msk.bf16.mxu0 %vm2577_vm0, %v2576_v1  ;;  %2323 = vmatpush3.bf16.msra.mxu0 %v2462_v14  ;;  %v2122_v8 = vunpack.c.l.bf16 %v2121_v7  ;;  %v2123_v9 = vunpack.c.h.bf16 %v2121_v7 }
 0x4c4   : > { %2324 = vmatprep.subr.bf16.mxu0 %v2576_v1 }
 0x4c5   : > { %v1913_v14 = vmul.f32 %v2122_v8, %v2106_v12 }
 0x4c7   : > { %2325 = vmatpush3.bf16.msra.mxu0 %v2463_v15  ;;  %v1914_v15 = vmul.f32 %v2123_v9, %v2106_v12 }
 0x4c8   : > { %2326 = vmatprep.subr.bf16.mxu0 %v2576_v1 }
 0x4cb   : > { %2327 = vmatpush3.bf16.msra.mxu0 %v2464_v10 }
 0x4cc   : > { %2328 = vmatprep.subr.bf16.mxu0 %v2576_v1 }
 0x4cf   : > { %2329 = vmatpush3.bf16.msra.mxu0 %v2465_v24 }
 0x4d0   : > { %2330 = vmatprep.subr.bf16.mxu0 %v2576_v1 }
 0x582   : > { %v1559_v17 = vpop.f32.mrf.mxu0 }
 0x583   : > { %v1560_v19 = vadd.f32 %v2072_v16, %v1559_v17 }
 0x584   : > { %v2300_v18 = vpop.f32.mrf.mxu0 }
 0x585   : > { %v1566_v23 = vadd.f32 %v1560_v19, %v2863_v53  ;;  %v2466_v53 = vld [vmem:[%s3174_s13 + $0x18] sm:$0xff]  }
 0x586   : > { %v1562_v20 = vpop.f32.mrf.mxu0  ;;  %2331 = vmatpush3.bf16.msra.mxu0 %v2466_v53 }
 0x587   : > { %v1563_v21 = vadd.f32 %v2072_v16, %v1562_v20  ;;  %2332 = vmatprep.subr.bf16.mxu0 %v2576_v1  ;;  %v2107_v16 = vld [vmem:[%s3166_s5] ss:$0 sm:$0xff] }
 0x588   : > { %v2301_v22 = vpop.f32.mrf.mxu0  ;;  %v1922_v18 = vadd.f32 %v2107_v16, %v1913_v14  ;;  %v1923_v19 = vadd.f32 %v2107_v16, %v1914_v15 }
 0x589   : > { %v1567_v27 = vadd.f32 %v1563_v21, %v2865_v54  ;;  %v2467_v54 = vld [vmem:[%s3174_s13 + $0x10] sm:$0xff]  }
 0x58a   : > { %2333 = vmatpush3.bf16.msra.mxu0 %v2467_v54 }
 0x58b   : > { %v1568_v28 = vpack.c.bf16 %v1567_v27, %v1566_v23  ;;  %2334 = vmatprep.subr.bf16.mxu0 %v2576_v1 }
 0x58d   : > { %2319 = vmatmul.mubr.bf16.vlgmr.msra.gmra.mxu1 %v1568_v28 }
 0x58e   : > { %2358 = vmatprep.mubr.msk.bf16.mxu1 %vm2577_vm0, %v2576_v1  ;;  %2335 = vmatpush3.bf16.msra.mxu0 %v2468_v29 }
 0x58f   : > { %2336 = vmatprep.subr.bf16.mxu0 %v2576_v1  ;;  %2343 = vmatpush3.bf16.msra.mxu1 %v2470_v32 }
 0x590   : > { %2344 = vmatprep.subr.bf16.mxu1 %v2576_v1 }
 0x592   : > { %2337 = vmatpush3.bf16.msra.mxu0 %v2469_v31 }
 0x593   : > { %2345 = vmatpush3.bf16.msra.mxu1 %v2471_v11 }
 0x594   : > { %2346 = vmatprep.subr.bf16.mxu1 %v2576_v1 }
 0x597   : > { %2347 = vmatpush3.bf16.msra.mxu1 %v2472_v25 }
 0x598   : > { %2348 = vmatprep.subr.bf16.mxu1 %v2576_v1 }
 0x59b   : > { %2349 = vmatpush3.bf16.msra.mxu1 %v2473_v30 }
 0x59c   : > { %2350 = vmatprep.subr.bf16.mxu1 %v2576_v1 }
 0x59f   : > { %2351 = vmatpush3.bf16.msra.mxu1 %v2474_v34 }
 0x5a0   : > { %2352 = vmatprep.subr.bf16.mxu1 %v2576_v1 }
 0x5a3   : > { %2353 = vmatpush3.bf16.msra.mxu1 %v2475_v13 }
 0x5a4   : > { %2354 = vmatprep.subr.bf16.mxu1 %v2576_v1 }
 0x5a7   : > { %2355 = vmatpush3.bf16.msra.mxu1 %v2476_v48 }
 0x5a8   : > { %2356 = vmatprep.subr.bf16.mxu1 %v2576_v1  ;;  %v1807_v1 = vld [vmem:[%s3177_s16] sm:$0x1] }
 0x5ab   : > { %2357 = vmatpush3.bf16.msra.mxu1 %v2477_v50 }
 0x64d   : > { %v1667_v26 = vpop.f32.mrf.mxu1 }
 0x64e   : > { %v1668_v36 = vadd.f32 %v1667_v26, %v1566_v23 }
 0x64f   : > { %v2320_v33 = vpop.f32.mrf.mxu1 }
 0x651   : > { %v1670_v35 = vpop.f32.mrf.mxu1 }
 0x652   : > { %v1671_v37 = vadd.f32 %v1670_v35, %v1567_v27 }
 0x653   : > { %v2321_v38 = vpop.f32.mrf.mxu1 }
 0x654   : > { %v1674_v39 = vadd.f32 %v1671_v37, %v1668_v36 }
 0x656   : > { %v1675_v40 = vrot.slane %v1674_v39, 4 }
 0x658   : > { %v1676_v41 = vadd.f32 %v1675_v40, %v1674_v39 }
 0x65a   : > { %v1677_v42 = vrot.slane %v1676_v41, 2 }
 0x65c   : > { %v1678_v43 = vadd.f32 %v1677_v42, %v1676_v41 }
 0x65e   : > { %v1679_v44 = vrot.slane %v1678_v43, 1 }
 0x660   : > { %v1680_v45 = vadd.f32 %v1679_v44, %v1678_v43 }
 0x662   : > { %v1682_v46 = vmul.f32 0.0625, %v1680_v45 }
 0x664   : > { %v1683_v47 = vpack.c.bf16 %v1682_v46, %v1682_v46 }
 0x666   : > { %2339 = vmatmul.mubr.bf16.vlgmr.msra.gmra.mxu0 %v1683_v47 }
 0x726   : > { %v1783_v51 = vpop.f32.mrf.mxu0 }
 0x727   : > { %v1784_v52 = vadd.f32 %v1783_v51, %v1700_v49 }
 0x728   : > { %v2340_v55 = vpop.f32.mrf.mxu0 }
 0x729   : > { %v1789_v56 = vmax.f32 %v1784_v52, 0.0 }
 0x72a   : > { %v1786_v58 = vpop.f32.mrf.mxu0 }
 0x72b   : > { %v1790_v59 = vpack.c.bf16 %v1789_v56, %v1789_v56 }
 0x72c   : > { %v2341_v60 = vpop.f32.mrf.mxu0 }
 0x72d   : > { %2359 = vmatmul.mubr.bf16.vlgmr.msra.gmra.mxu1 %v1790_v59 }
 0x7ed   : > { %v1890_v61 = vpop.f32.mrf.mxu1 }
 0x7ee   : > { %v1891_v63 = vadd.f32 %v1890_v61, %v1807_v1 }
 0x7ef   : > { %v2360_v0 = vpop.f32.mrf.mxu1 }
 0x7f0   : > { %v2105_v2 = vmul.f32 -1.442695, %v1891_v63 }
 0x7f1   : > { %v1893_v3 = vpop.f32.mrf.mxu1 }
 0x7f2   : > { %2510 = vpow2.f32 %v2105_v2 }
 0x7f3   : > { %v2361_v4 = vpop.f32.mrf.mxu1 }
 0x7ff   : > { %v2511_v5 = vpop.eup %2510 }
 0x800   : > { %v1899_v6 = vadd.f32 1.0, %v2511_v5 }
 0x802   : > { %2512 = vrcp.f32 %v1899_v6 }
 0x80f   : > { %v2513_v17 = vpop.eup %2512 }
 0x810   : > { %v1927_v20 = vrot.slane %v2513_v17, %v746_v62 }
 0x812   : > { %v1928_v21 = vmul.f32 %v1927_v20, %v1668_v36  ;;  %v1929_v22 = vmul.f32 %v1927_v20, %v1671_v37 }
 0x814   : > { %v1930_v23 = vadd.f32 %v1928_v21, %v1922_v18  ;;  %v1931_v27 = vadd.f32 %v1929_v22, %v1923_v19 }
 0x816   : > { %v1932_v57 = vmax.f32 %v1930_v23, 0.0  ;;  %v1933_v62 = vmax.f32 %v1931_v27, 0.0 }
 0x818   : > { %1934 = vst [vmem:[%s556_s17] sm:$0xff] %v1932_v57  ;;  %1935 = vst [vmem:[%s556_s17 + $0x8] sm:$0xff] %v1933_v62 }
 0x819   : > { %2527 = shalt.err (!%p2524_p3)
}
 0x81a   : > { %s2528_s24 = scalar_lea.hbm %s3117_s21, 256  ;;  %s2532_s17 = scalar_lea.hbm %s3203_s18, 512 }
 0x81b   : > { %p2529_p4 = scmp.ne.s32.totalorder %s3117_s21, %s2528_s24  ;;  %p2533_p9 = scmp.lt.s32.totalorder %s3117_s21, %s3203_s18 }
 0x81c   : > { %p2534_p10 = scmp.lt.s32.totalorder %s2532_s17, %s2528_s24 }
 0x81d   : > { %p2530_p7 = pnand %p2529_p4, %p2710_p5 }
 0x81e   : > { %p2535_p11 = por %p2534_p10, %p2533_p9 }
 0x81f   : > { %p2531_p8 = pneg %p2530_p7 }
 0x821   : > { %p2536_p12 = pnand %p2535_p11, %p2531_p8 }
 0x823   : > { %2539 = shalt.err (!%p2536_p12)
}
 0x824   : > { %s2580_s28 = smov 128   ;;  %s2581_s19 = smov 8  }
 0x825   : > { %2362 = dma.vmem_to_hbm [thread:$0]  (%p2710_p5), %s3119_s1, 256, %s3117_s21, %s3121_s0, %s2580_s28, %s2580_s28, %s2581_s19  }
 0x826 PF: > { %s3204_s26 = sld [smem:[#allocation7_spill]] }
 0x827   : > { %s3205_s27 = sld [smem:[#allocation5_spill]] }
 0x82c   : > { %p2368_p13 = scmp.ge.s32.totalorder %s3204_s26, 2 }
 0x82d   : > { %s1965_s22 = sand.u32 1, %s3205_s27  }
 0x82e   : > { %p2365_p0 = pnand %p2368_p13, %p2714_p6  ;;  %s1966_s24 = scalar_lea.sflag [#allocation3], %s1965_s22 }
 0x830   : > { %p2366_p1 = pneg %p2365_p0 }
 0x832   : > { %2557 = dma.done.wait (%p2366_p1), %s1966_s24, 256  }
 0x833   : > { %2559 = vsyncadd (%p2366_p1), %s1966_s24, 4294967040  ;;  %s3207_s27 = sld [smem:[#allocation8_spill]]  ;;  %s3210_s24 = smov %s2566_s25 }
 0x834   : > { %s3208_s17 = sld [smem:[#allocation6_spill]] }
 0x835   : > { %s3209_s26 = sld [smem:[#allocation9_spill]] }
 0x839   : > { %p27_p2 = scmp.ge.s32.totalorder %s3207_s27, 4  }
 0x83a   : > { %s3211_s25 = smov %s3208_s17 }
 0x83b   :  { %29 = sbr.rel (!%p27_p2) target bundleno = 7 (0x7), region = 126 }
 0x840   :  { %1971 = vsyncpa [#allocation3], 1 }
 0x841   :  { %1973 = vsyncpa [#allocation3 + $0x1], 1 }

</bundles_post_ra>
